<compile_context>
chip_gen: v6e
topology: v6e:2x2x1
jax: 0.10.0
libtpu: 0.0.40
codegen_flags: <defaults>
</compile_context>

<pallas_src>
import numpy as np

import jax
import jax.numpy as jnp
from jax import lax
from jax.experimental import pallas as pl
from jax.experimental.pallas import tpu as pltpu

EPS = 1e-12  # matches torch.nn.functional.normalize eps


# ----------------------------- fused Pallas kernel ---------------------------

def _fused_region_vlad_kernel(x_ref, me_ref, wb_ref, bb_ref, wc_ref, bc_ref,
                              cent_ref, out_ref):
    # x_ref   : (1, Cin, S)  one image, channels on sublanes, S = H*W lane-dense
    # me_ref  : (S, 4*K)     quarter masks expanded per cluster (TL,TR,BL,BR blocks)
    # wb_ref  : (Cin, D)  bb_ref: (1, D)   base 1x1 conv (+ReLU)
    # wc_ref  : (D, K)    bc_ref: (1, K)   soft-assign 1x1 conv
    # cent_ref: (K, D)                     NetVLAD centroids
    # out_ref : (1, 9, K, D)               intra+L2 normalized region VLADs
    dn = (((0,), (0,)), ((), ()))          # contract over dim 0 of both operands
    K, D = cent_ref.shape
    S = me_ref.shape[0]

    x = x_ref[0]                                               # (Cin, S)

    # base model: 1x1 conv + ReLU (contract over tiny Cin; feature map stays in VMEM)
    feat = lax.dot_general(x, wb_ref[...], dn,
                           preferred_element_type=jnp.float32) + bb_ref[...]
    feat = jnp.maximum(feat, 0.0)                              # (S, D)

    # per-location L2 norm: x * rsqrt(max(||x||^2, eps^2)) == x / max(||x||, eps)
    ss = jnp.sum(feat * feat, axis=-1, keepdims=True)
    xn = feat * lax.rsqrt(jnp.maximum(ss, EPS * EPS))          # (S, D)

    # soft assignment: 1x1 conv + softmax over clusters (denominator on the EUP)
    # TODO(synk): for production K=64, pad K to 128 with -inf bias for lane density.
    logits = jnp.dot(xn, wc_ref[...],
                     preferred_element_type=jnp.float32) + bc_ref[...]
    e = jnp.exp(logits - jnp.max(logits, axis=-1, keepdims=True))
    a = e * pl.reciprocal(jnp.sum(e, axis=-1, keepdims=True), approx=True)  # (S, K)

    # ONE matmul for all 4 quarter VLADs: stacked masked assignments (S, 4K) against
    # [xn | 1] (S, D+1). The ones column yields the per-quarter assignment sums in
    # the same MXU pass (no separate tiny (K, 4) matmul).
    am = jnp.concatenate([a, a, a, a], axis=-1) * me_ref[...]            # (S, 4K)
    rhs = jnp.concatenate([xn, jnp.ones((S, 1), jnp.float32)], axis=-1)  # (S, D+1)
    w = lax.dot_general(am, rhs, dn,
                        preferred_element_type=jnp.float32)              # (4K, D+1)

    vq = w[:, :D].reshape(4, K, D)          # per-quarter a^T @ xn
    asum = w[:, D:].reshape(4, K, 1)        # per-quarter sum of assignments
    q = vq - asum * cent_ref[...]           # (4, K, D) quarter VLADs
    q0, q1, q2, q3 = q[0], q[1], q[2], q[3]

    # 9 regions: full, top, bottom, left, right, TL, TR, BL, BR
    regions = jnp.stack(
        [q0 + q1 + q2 + q3,
         q0 + q1, q2 + q3, q0 + q2, q1 + q3,
         q0, q1, q2, q3], axis=0)           # (9, K, D)

    # intra-normalize each cluster row, then L2-normalize the flattened descriptor.
    # Both use rsqrt; the flat norm is derived from the per-row squared sums.
    sc = jnp.sum(regions * regions, axis=-1, keepdims=True)              # (9, K, 1)
    inv_row = lax.rsqrt(jnp.maximum(sc, EPS * EPS))
    s2 = jnp.sum(sc * inv_row * inv_row, axis=-2, keepdims=True)         # (9, 1, 1)
    inv_flat = lax.rsqrt(jnp.maximum(s2, EPS * EPS))

    # single store for all 9 regions of this image (lane-dense: D % 128 == 0)
    out_ref[0] = regions * (inv_row * inv_flat)


def _quarter_masks_expanded(H, W, K):
    # (S, 4*K) masks: column q*K + k is 1 where spatial location s lies in quarter q
    # (q order: TL, TR, BL, BR), matching the (S, 4K) stacked-assignment layout.
    hh = (np.arange(H) >= (H // 2)).astype(np.int32)
    ww = (np.arange(W) >= (W // 2)).astype(np.int32)
    qid = (hh[:, None] * 2 + ww[None, :]).reshape(-1)            # (S,)
    onehot = (qid[:, None] == np.arange(4)[None, :])             # (S, 4)
    return np.repeat(onehot, K, axis=1).astype(np.float32)       # (S, 4K)


def region_vlad_descriptors(x_ncs, masks_exp, params):
    # x_ncs: (B, Cin, S) -> (B, 9, K, D) normalized region VLAD descriptors
    B, Cin, S = x_ncs.shape
    D = params["w_base"].shape[1]
    K = params["centroids"].shape[0]
    return pl.pallas_call(
        _fused_region_vlad_kernel,
        out_shape=jax.ShapeDtypeStruct((B, 9, K, D), jnp.float32),
        grid=(B,),
        in_specs=[
            pl.BlockSpec((1, Cin, S), lambda n: (n, 0, 0)),
            pl.BlockSpec((S, 4 * K), lambda n: (0, 0)),
            pl.BlockSpec((Cin, D), lambda n: (0, 0)),
            pl.BlockSpec((1, D), lambda n: (0, 0)),
            pl.BlockSpec((D, K), lambda n: (0, 0)),
            pl.BlockSpec((1, K), lambda n: (0, 0)),
            pl.BlockSpec((K, D), lambda n: (0, 0)),
        ],
        out_specs=pl.BlockSpec((1, 9, K, D), lambda n: (n, 0, 0, 0)),
        compiler_params=pltpu.CompilerParams(
            # on v7x use pltpu.CORE_PARALLEL to split the batch across both TCs
            dimension_semantics=("parallel",),
            vmem_limit_bytes=32 * 1024 * 1024),
    )(x_ncs, masks_exp, params["w_base"], params["b_base"].reshape(1, D),
      params["wc"], params["bc"].reshape(1, K), params["centroids"])


# ------------------------------- JAX glue ------------------------------------

def embed_region_forward(x_nchw, params, tuple_size=1):
    # training-mode forward: base_model -> fused per-image 9-region NetVLAD
    # descriptors -> anchor/pair split -> region similarity.
    B, Cin, H, W = x_nchw.shape
    S = H * W
    K = params["centroids"].shape[0]
    D = params["w_base"].shape[1]

    # NCHW is already (B, Cin, H*W)-contiguous: no transpose, S stays lane-dense.
    x = x_nchw.reshape(B, Cin, S).astype(jnp.float32)
    masks_exp = jnp.asarray(_quarter_masks_expanded(H, W, K))

    desc = region_vlad_descriptors(x, masks_exp, params)      # (B, 9, K, D)
    # TODO(synk): pool_x (global-average-pooled base feature) is unused by the
    # training path and is not returned.

    group = B // tuple_size
    desc = desc.reshape(tuple_size, group, 9, K * D)          # free flatten, d-fastest
    vlad_A = desc[:, :1]                                      # (T, 1, 9, K*D)
    vlad_B = desc[:, 1:]                                      # (T, group-1, 9, K*D)

    # 9x9 region similarity on tiny descriptors: plain XLA einsum (anchor block is
    # broadcast implicitly, never materialized per pair).
    score = jnp.einsum("trl,tpsl->tprs", vlad_A[:, 0], vlad_B)
    return score, vlad_A, vlad_B


# ----------------------- Pure-JAX reference (checking) -----------------------

def reference_forward(x_nchw, params, tuple_size=1):
    B, Cin, H, W = x_nchw.shape
    x = jnp.transpose(x_nchw, (0, 2, 3, 1)).astype(jnp.float32)
    feat = jnp.maximum(
        jnp.einsum("nhwc,cd->nhwd", x, params["w_base"]) + params["b_base"], 0.0)
    D = params["w_base"].shape[1]
    group = B // tuple_size
    feat = feat.reshape(tuple_size, group, H, W, D)
    anchors = feat[:, 0]
    pairs = feat[:, 1:].reshape(tuple_size * (group - 1), H, W, D)

    def quarters(f):
        N = f.shape[0]
        q = f.reshape(N, 2, H // 2, 2, W // 2, D)
        q = jnp.transpose(q, (0, 1, 3, 2, 4, 5))
        return q.reshape(N, 4, (H // 2) * (W // 2), D)

    def nv(q):
        N = q.shape[0]
        q = q.reshape(N * 4, -1, D)
        qn = q / jnp.maximum(jnp.linalg.norm(q, axis=-1, keepdims=True), EPS)
        logits = jnp.einsum("msc,ck->msk", qn, params["wc"]) + params["bc"]
        a = jax.nn.softmax(logits, axis=-1)
        K = params["centroids"].shape[0]
        vlad = (jnp.einsum("msk,msc->mkc", a, qn)
                - jnp.sum(a, axis=1)[..., None] * params["centroids"][None])
        return vlad.reshape(N, 4, K, D)

    vA_q, vB_q = nv(quarters(anchors)), nv(quarters(pairs))

    def half(v):
        return jnp.stack((v[:, 0] + v[:, 1], v[:, 2] + v[:, 3],
                          v[:, 0] + v[:, 2], v[:, 1] + v[:, 3]), axis=1)

    vA = jnp.concatenate((jnp.sum(vA_q, 1, keepdims=True), half(vA_q), vA_q), axis=1)
    vB = jnp.concatenate((jnp.sum(vB_q, 1, keepdims=True), half(vB_q), vB_q), axis=1)

    def nrm(v):
        intra = v / jnp.maximum(jnp.linalg.norm(v, axis=-1, keepdims=True), EPS)
        flat = intra.reshape(v.shape[0], v.shape[1], -1)
        return flat / jnp.maximum(jnp.linalg.norm(flat, axis=-1, keepdims=True), EPS)

    vA, vB = nrm(vA), nrm(vB)
    R, L = vA.shape[1], vA.shape[2]
    vA = vA.reshape(tuple_size, -1, R, L)
    vB = vB.reshape(tuple_size, -1, R, L)
    aE = jnp.broadcast_to(vA, vB.shape)
    score = jnp.einsum("tnrl,tnsl->tnrs", aE, vB)
    return score, vA, vB


# ---------------------------------- main --------------------------------------

if __name__ == "__main__":
    key = jax.random.PRNGKey(0)
    k1, k2, k3, k4, k5, k6 = jax.random.split(key, 6)

    # D chosen as a multiple of 128 so in-kernel (K, D) rows and the per-image output
    # store are full-lane (unmasked). Production OpenIBL sizes are D=512, K=64.
    Cin, D, K, H, W = 4, 128, 8, 16, 16
    tuple_size = 1
    group = 4                               # 1 anchor + 3 pairs per tuple
    B = tuple_size * group

    params = dict(
        w_base=jax.random.normal(k1, (Cin, D), jnp.float32) * 0.2,
        b_base=jax.random.normal(k2, (D,), jnp.float32) * 0.05,
        wc=jax.random.normal(k3, (D, K), jnp.float32) * 0.3,
        bc=jax.random.normal(k4, (K,), jnp.float32) * 0.05,
        centroids=jax.random.normal(k5, (K, D), jnp.float32) * 0.5,
    )
    x = jax.random.normal(k6, (B, Cin, H, W), jnp.float32)

    fwd = jax.jit(embed_region_forward, static_argnames=("tuple_size",))
    score, vlad_A, vlad_B = jax.block_until_ready(
        fwd(x, params, tuple_size=tuple_size))

    ref_score, ref_A, ref_B = reference_forward(x, params, tuple_size=tuple_size)
    assert score.shape == (tuple_size, group - 1, 9, 9), score.shape
    assert vlad_A.shape == (tuple_size, 1, 9, K * D), vlad_A.shape
    assert vlad_B.shape == (tuple_size, group - 1, 9, K * D), vlad_B.shape
    err_s = float(np.max(np.abs(np.asarray(score) - np.asarray(ref_score))))
    err_a = float(np.max(np.abs(np.asarray(vlad_A) - np.asarray(ref_A))))
    err_b = float(np.max(np.abs(np.asarray(vlad_B) - np.asarray(ref_B))))
    assert err_s < 2e-3, f"max |score - ref| = {err_s}"
    assert err_a < 2e-3 and err_b < 2e-3, (err_a, err_b)

    print("KERNEL_OK")
</pallas_src>

<mosaic_0001>
module attributes {stable_mosaic.version = 11 : i64} {
  func.func @_fused_region_vlad_kernel(%arg0: i32, %arg1: memref<1x4x256xf32, #tpu.memory_space<vmem>>, %arg2: memref<256x32xf32, #tpu.memory_space<vmem>>, %arg3: memref<4x128xf32, #tpu.memory_space<vmem>>, %arg4: memref<1x128xf32, #tpu.memory_space<vmem>>, %arg5: memref<128x8xf32, #tpu.memory_space<vmem>>, %arg6: memref<1x8xf32, #tpu.memory_space<vmem>>, %arg7: memref<8x128xf32, #tpu.memory_space<vmem>>, %arg8: memref<1x9x8x128xf32, #tpu.memory_space<vmem>>) attributes {dimension_semantics = [#tpu.dimension_semantics<parallel>], iteration_bounds = array<i64: 4>, scalar_prefetch = 0 : i64, scratch_operands = 0 : i64, tpu.core_type = #tpu.core_type<tc>, window_params = [{transform_indices = @transform_0, window_bounds = array<i64: 1, 4, 256>}, {pipeline_mode = #tpu.pipeline_mode<synchronous>, transform_indices = @transform_1, window_bounds = array<i64: 256, 32>}, {pipeline_mode = #tpu.pipeline_mode<synchronous>, transform_indices = @transform_2, window_bounds = array<i64: 4, 128>}, {pipeline_mode = #tpu.pipeline_mode<synchronous>, transform_indices = @transform_3, window_bounds = array<i64: 1, 128>}, {pipeline_mode = #tpu.pipeline_mode<synchronous>, transform_indices = @transform_4, window_bounds = array<i64: 128, 8>}, {pipeline_mode = #tpu.pipeline_mode<synchronous>, transform_indices = @transform_5, window_bounds = array<i64: 1, 8>}, {pipeline_mode = #tpu.pipeline_mode<synchronous>, transform_indices = @transform_6, window_bounds = array<i64: 8, 128>}, {transform_indices = @transform_7, window_bounds = array<i64: 1, 9, 8, 128>}]} {
    %c0 = arith.constant 0 : index
    %c0_0 = arith.constant 0 : index
    %c0_1 = arith.constant 0 : index
    %0 = vector.load %arg1[%c0, %c0_0, %c0_1] : memref<1x4x256xf32, #tpu.memory_space<vmem>>, vector<1x4x256xf32>
    %1 = vector.shape_cast %0 : vector<1x4x256xf32> to vector<4x256xf32>
    %c0_2 = arith.constant 0 : index
    %c0_3 = arith.constant 0 : index
    %2 = vector.load %arg3[%c0_2, %c0_3] : memref<4x128xf32, #tpu.memory_space<vmem>>, vector<4x128xf32>
    %cst = arith.constant dense<0.000000e+00> : vector<256x128xf32>
    %3 = tpu.matmul %1, %2, %cst {dimension_numbers = #tpu.dot_dimension_numbers<[0], [0], [1], [1], [0, 1, 1, 1], [], []>} : vector<4x256xf32>, vector<4x128xf32>, vector<256x128xf32> -> vector<256x128xf32>
    %c0_4 = arith.constant 0 : index
    %c0_5 = arith.constant 0 : index
    %4 = vector.load %arg4[%c0_4, %c0_5] : memref<1x128xf32, #tpu.memory_space<vmem>>, vector<1x128xf32>
    %5 = vector.broadcast %4 : vector<1x128xf32> to vector<256x128xf32>
    %6 = arith.addf %3, %5 : vector<256x128xf32>
    %cst_6 = arith.constant 0.000000e+00 : f32
    %7 = vector.broadcast %cst_6 : f32 to vector<256x128xf32>
    %8 = arith.maximumf %6, %7 : vector<256x128xf32>
    %9 = arith.mulf %8, %8 : vector<256x128xf32>
    %cst_7 = arith.constant dense<0.000000e+00> : vector<256xf32>
    %10 = vector.multi_reduction <add>, %9, %cst_7 [1] : vector<256x128xf32> to vector<256xf32>
    %11 = vector.shape_cast %10 : vector<256xf32> to vector<256x1xf32>
    %cst_8 = arith.constant 1.000000e-24 : f32
    %12 = vector.broadcast %cst_8 : f32 to vector<256x1xf32>
    %13 = arith.maximumf %11, %12 : vector<256x1xf32>
    %14 = math.rsqrt %13 : vector<256x1xf32>
    %15 = vector.broadcast %14 : vector<256x1xf32> to vector<256x128xf32>
    %16 = arith.mulf %8, %15 : vector<256x128xf32>
    %c0_9 = arith.constant 0 : index
    %c0_10 = arith.constant 0 : index
    %17 = vector.load %arg5[%c0_9, %c0_10] : memref<128x8xf32, #tpu.memory_space<vmem>>, vector<128x8xf32>
    %cst_11 = arith.constant dense<0.000000e+00> : vector<256x8xf32>
    %18 = tpu.matmul %16, %17, %cst_11 {dimension_numbers = #tpu.dot_dimension_numbers<[1], [0], [0], [1], [0, 0, 1, 1], [], []>} : vector<256x128xf32>, vector<128x8xf32>, vector<256x8xf32> -> vector<256x8xf32>
    %c0_12 = arith.constant 0 : index
    %c0_13 = arith.constant 0 : index
    %19 = vector.load %arg6[%c0_12, %c0_13] : memref<1x8xf32, #tpu.memory_space<vmem>>, vector<1x8xf32>
    %20 = vector.broadcast %19 : vector<1x8xf32> to vector<256x8xf32>
    %21 = arith.addf %18, %20 : vector<256x8xf32>
    %cst_14 = arith.constant dense<0xFF800000> : vector<256xf32>
    %22 = vector.multi_reduction <maximumf>, %21, %cst_14 [1] : vector<256x8xf32> to vector<256xf32>
    %23 = vector.shape_cast %22 : vector<256xf32> to vector<256x1xf32>
    %24 = vector.broadcast %23 : vector<256x1xf32> to vector<256x8xf32>
    %25 = arith.subf %21, %24 : vector<256x8xf32>
    %26 = math.exp %25 : vector<256x8xf32>
    %cst_15 = arith.constant dense<0.000000e+00> : vector<256xf32>
    %27 = vector.multi_reduction <add>, %26, %cst_15 [1] : vector<256x8xf32> to vector<256xf32>
    %28 = vector.shape_cast %27 : vector<256xf32> to vector<256x1xf32>
    %29 = tpu.reciprocal %28 {approx = true} : vector<256x1xf32> -> vector<256x1xf32>
    %30 = vector.broadcast %29 : vector<256x1xf32> to vector<256x8xf32>
    %31 = arith.mulf %26, %30 : vector<256x8xf32>
    %32 = tpu.concatenate %31, %31, %31, %31 in 1 : vector<256x8xf32>, vector<256x8xf32>, vector<256x8xf32>, vector<256x8xf32> -> vector<256x32xf32>
    %c0_16 = arith.constant 0 : index
    %c0_17 = arith.constant 0 : index
    %33 = vector.load %arg2[%c0_16, %c0_17] : memref<256x32xf32, #tpu.memory_space<vmem>>, vector<256x32xf32>
    %34 = arith.mulf %32, %33 : vector<256x32xf32>
    %cst_18 = arith.constant 1.000000e+00 : f32
    %35 = vector.broadcast %cst_18 : f32 to vector<256x1xf32>
    %36 = tpu.concatenate %16, %35 in 1 : vector<256x128xf32>, vector<256x1xf32> -> vector<256x129xf32>
    %cst_19 = arith.constant dense<0.000000e+00> : vector<32x129xf32>
    %37 = tpu.matmul %34, %36, %cst_19 {dimension_numbers = #tpu.dot_dimension_numbers<[0], [0], [1], [1], [0, 1, 1, 1], [], []>} : vector<256x32xf32>, vector<256x129xf32>, vector<32x129xf32> -> vector<32x129xf32>
    %38 = vector.extract_strided_slice %37 {offsets = [0, 0], sizes = [32, 128], strides = [1, 1]} : vector<32x129xf32> to vector<32x128xf32>
    %39 = vector.shape_cast %38 : vector<32x128xf32> to vector<4x8x128xf32>
    %40 = vector.extract_strided_slice %37 {offsets = [0, 128], sizes = [32, 1], strides = [1, 1]} : vector<32x129xf32> to vector<32x1xf32>
    %41 = vector.shape_cast %40 : vector<32x1xf32> to vector<4x8x1xf32>
    %c0_20 = arith.constant 0 : index
    %c0_21 = arith.constant 0 : index
    %42 = vector.load %arg7[%c0_20, %c0_21] : memref<8x128xf32, #tpu.memory_space<vmem>>, vector<8x128xf32>
    %43 = vector.shape_cast %42 : vector<8x128xf32> to vector<1x8x128xf32>
    %44 = vector.broadcast %41 : vector<4x8x1xf32> to vector<4x8x128xf32>
    %45 = vector.broadcast %43 : vector<1x8x128xf32> to vector<4x8x128xf32>
    %46 = arith.mulf %44, %45 : vector<4x8x128xf32>
    %47 = arith.subf %39, %46 : vector<4x8x128xf32>
    %48 = vector.extract_strided_slice %47 {offsets = [0, 0, 0], sizes = [1, 8, 128], strides = [1, 1, 1]} : vector<4x8x128xf32> to vector<1x8x128xf32>
    %49 = vector.shape_cast %48 : vector<1x8x128xf32> to vector<8x128xf32>
    %50 = vector.extract_strided_slice %47 {offsets = [1, 0, 0], sizes = [1, 8, 128], strides = [1, 1, 1]} : vector<4x8x128xf32> to vector<1x8x128xf32>
    %51 = vector.shape_cast %50 : vector<1x8x128xf32> to vector<8x128xf32>
    %52 = vector.extract_strided_slice %47 {offsets = [2, 0, 0], sizes = [1, 8, 128], strides = [1, 1, 1]} : vector<4x8x128xf32> to vector<1x8x128xf32>
    %53 = vector.shape_cast %52 : vector<1x8x128xf32> to vector<8x128xf32>
    %54 = vector.extract_strided_slice %47 {offsets = [3, 0, 0], sizes = [1, 8, 128], strides = [1, 1, 1]} : vector<4x8x128xf32> to vector<1x8x128xf32>
    %55 = vector.shape_cast %54 : vector<1x8x128xf32> to vector<8x128xf32>
    %56 = arith.addf %49, %51 : vector<8x128xf32>
    %57 = arith.addf %56, %53 : vector<8x128xf32>
    %58 = arith.addf %57, %55 : vector<8x128xf32>
    %59 = arith.addf %49, %51 : vector<8x128xf32>
    %60 = arith.addf %53, %55 : vector<8x128xf32>
    %61 = arith.addf %49, %53 : vector<8x128xf32>
    %62 = arith.addf %51, %55 : vector<8x128xf32>
    %63 = vector.shape_cast %58 : vector<8x128xf32> to vector<1x8x128xf32>
    %64 = vector.shape_cast %59 : vector<8x128xf32> to vector<1x8x128xf32>
    %65 = vector.shape_cast %60 : vector<8x128xf32> to vector<1x8x128xf32>
    %66 = vector.shape_cast %61 : vector<8x128xf32> to vector<1x8x128xf32>
    %67 = vector.shape_cast %62 : vector<8x128xf32> to vector<1x8x128xf32>
    %68 = vector.shape_cast %49 : vector<8x128xf32> to vector<1x8x128xf32>
    %69 = vector.shape_cast %51 : vector<8x128xf32> to vector<1x8x128xf32>
    %70 = vector.shape_cast %53 : vector<8x128xf32> to vector<1x8x128xf32>
    %71 = vector.shape_cast %55 : vector<8x128xf32> to vector<1x8x128xf32>
    %72 = tpu.concatenate %63, %64, %65, %66, %67, %68, %69, %70, %71 in 0 : vector<1x8x128xf32>, vector<1x8x128xf32>, vector<1x8x128xf32>, vector<1x8x128xf32>, vector<1x8x128xf32>, vector<1x8x128xf32>, vector<1x8x128xf32>, vector<1x8x128xf32>, vector<1x8x128xf32> -> vector<9x8x128xf32>
    %73 = arith.mulf %72, %72 : vector<9x8x128xf32>
    %cst_22 = arith.constant dense<0.000000e+00> : vector<9x8xf32>
    %74 = vector.multi_reduction <add>, %73, %cst_22 [2] : vector<9x8x128xf32> to vector<9x8xf32>
    %75 = vector.shape_cast %74 : vector<9x8xf32> to vector<9x8x1xf32>
    %cst_23 = arith.constant 1.000000e-24 : f32
    %76 = vector.broadcast %cst_23 : f32 to vector<9x8x1xf32>
    %77 = arith.maximumf %75, %76 : vector<9x8x1xf32>
    %78 = math.rsqrt %77 : vector<9x8x1xf32>
    %79 = arith.mulf %75, %78 : vector<9x8x1xf32>
    %80 = arith.mulf %79, %78 : vector<9x8x1xf32>
    %cst_24 = arith.constant dense<0.000000e+00> : vector<9x1xf32>
    %81 = vector.multi_reduction <add>, %80, %cst_24 [1] : vector<9x8x1xf32> to vector<9x1xf32>
    %82 = vector.shape_cast %81 : vector<9x1xf32> to vector<9x1x1xf32>
    %cst_25 = arith.constant 1.000000e-24 : f32
    %83 = vector.broadcast %cst_25 : f32 to vector<9x1x1xf32>
    %84 = arith.maximumf %82, %83 : vector<9x1x1xf32>
    %85 = math.rsqrt %84 : vector<9x1x1xf32>
    %86 = vector.broadcast %85 : vector<9x1x1xf32> to vector<9x8x1xf32>
    %87 = arith.mulf %78, %86 : vector<9x8x1xf32>
    %88 = vector.broadcast %87 : vector<9x8x1xf32> to vector<9x8x128xf32>
    %89 = arith.mulf %72, %88 : vector<9x8x128xf32>
    %c0_26 = arith.constant 0 : index
    %c0_27 = arith.constant 0 : index
    %c0_28 = arith.constant 0 : index
    %c0_29 = arith.constant 0 : index
    %90 = vector.load %arg8[%c0_26, %c0_27, %c0_28, %c0_29] : memref<1x9x8x128xf32, #tpu.memory_space<vmem>>, vector<1x9x8x128xf32>
    %91 = vector.shape_cast %90 : vector<1x9x8x128xf32> to vector<9x8x128xf32>
    %92 = vector.shape_cast %89 : vector<9x8x128xf32> to vector<1x9x8x128xf32>
    tpu.vector_store %arg8[%c0_26, %c0_27, %c0_28, %c0_29], %92 {strides = array<i32>} : memref<1x9x8x128xf32, #tpu.memory_space<vmem>>, vector<1x9x8x128xf32>,
    return
  }
  func.func @transform_0(%arg0: i32) -> (i32, i32, i32) {
    %c0_i32 = arith.constant 0 : i32
    %c0_i32_0 = arith.constant 0 : i32
    %c0_i32_1 = arith.constant 0 : i32
    return %arg0, %c0_i32, %c0_i32_0 : i32, i32, i32
  }
  func.func @transform_1(%arg0: i32) -> (i32, i32) {
    %c0_i32 = arith.constant 0 : i32
    %c0_i32_0 = arith.constant 0 : i32
    %c0_i32_1 = arith.constant 0 : i32
    return %c0_i32, %c0_i32_0 : i32, i32
  }
  func.func @transform_2(%arg0: i32) -> (i32, i32) {
    %c0_i32 = arith.constant 0 : i32
    %c0_i32_0 = arith.constant 0 : i32
    %c0_i32_1 = arith.constant 0 : i32
    return %c0_i32, %c0_i32_0 : i32, i32
  }
  func.func @transform_3(%arg0: i32) -> (i32, i32) {
    %c0_i32 = arith.constant 0 : i32
    %c0_i32_0 = arith.constant 0 : i32
    %c0_i32_1 = arith.constant 0 : i32
    return %c0_i32, %c0_i32_0 : i32, i32
  }
  func.func @transform_4(%arg0: i32) -> (i32, i32) {
    %c0_i32 = arith.constant 0 : i32
    %c0_i32_0 = arith.constant 0 : i32
    %c0_i32_1 = arith.constant 0 : i32
    return %c0_i32, %c0_i32_0 : i32, i32
  }
  func.func @transform_5(%arg0: i32) -> (i32, i32) {
    %c0_i32 = arith.constant 0 : i32
    %c0_i32_0 = arith.constant 0 : i32
    %c0_i32_1 = arith.constant 0 : i32
    return %c0_i32, %c0_i32_0 : i32, i32
  }
  func.func @transform_6(%arg0: i32) -> (i32, i32) {
    %c0_i32 = arith.constant 0 : i32
    %c0_i32_0 = arith.constant 0 : i32
    %c0_i32_1 = arith.constant 0 : i32
    return %c0_i32, %c0_i32_0 : i32, i32
  }
  func.func @transform_7(%arg0: i32) -> (i32, i32, i32, i32) {
    %c0_i32 = arith.constant 0 : i32
    %c0_i32_0 = arith.constant 0 : i32
    %c0_i32_1 = arith.constant 0 : i32
    %c0_i32_2 = arith.constant 0 : i32
    return %arg0, %c0_i32, %c0_i32_0, %c0_i32_1 : i32, i32, i32, i32
  }
}

</mosaic_0001>

<bundles_post_ra>
// kernel: embed_region_forward.1
= control target key start
LH: loop header
LB: loop body
LE: loop exit
PB: predicated region body
PF: predicated region fallthrough
CT: control target
= control target key end

     0   :  { %s3000_s24 = smov 0   ;;  %s4520_s0 = inlined_call_operand.vmem [shape: f32[4,4,256], index: 0, kind: input, shape index: {}]   ;;  %s4521_s1 = inlined_call_operand.vmem [shape: f32[256,32], index: 1, kind: input, shape index: {}]   ;;  %s4522_s2 = inlined_call_operand.vmem [shape: f32[4,128], index: 2, kind: input, shape index: {}]   ;;  %s4523_s3 = inlined_call_operand.vmem [shape: f32[1,128], index: 3, kind: input, shape index: {}]   ;;  %s4524_s4 = inlined_call_operand.vmem [shape: f32[128,8], index: 4, kind: input, shape index: {}]   ;;  %s4525_s5 = inlined_call_operand.vmem [shape: f32[1,8], index: 5, kind: input, shape index: {}]   ;;  %s4526_s6 = inlined_call_operand.vmem [shape: f32[8,128], index: 6, kind: input, shape index: {}]   ;;  %s4527_s7 = inlined_call_operand.vmem [shape: f32[4,9,8,128], index: 7, kind: output, shape index: {}]  }
   0x1 LB: > { %s2393_s25 = sadd.s32 4294967295, %s2953_s24   ;;  %p2397_p0 = scmp.ge.s32.totalorder %s2953_s24, 1  ;;  %s2953_s24 = sphi %s3000_s24, %s17_s24  }
   0x2   : > { %p237_p1 = scmp.lt.s32.totalorder %s2953_s24, 5 }
   0x4   : > { %p238_p2 = pnand %p2397_p0, %p237_p1 }
   0x6   : > { %241 = sbr.rel (%p238_p2) target bundleno = 1998 (0x7ce), region = 48 }
   0xb   : > { %p269_p3 = scmp.lt.s32.totalorder %s2393_s25, 3  ;;  %v280_v0 = vld [vmem:[%s4522_s2] sm:$0xf]  ;;  %vm452_vm0 = vcmask 1043456   ;;  %vm355_vm1 = vcmask 31744   ;;  %v920_v43 = vld [vmem:[%s4524_s4 + $0x78] sm:$0xff] }
   0xc   : > { %2520 = vmatprep.subr.msk.mxu0 %vm452_vm0, %v280_v0  ;;  %v3052_v35 = vld [vmem:[%s4523_s3] ss:$0 sm:$0xff]  ;;  %v919_v44 = vld [vmem:[%s4524_s4 + $0x70] sm:$0xff]  ;;  %2570 = vmatprep.subr.mxu1 %v920_v43  ;;  %v918_v45 = vld [vmem:[%s4524_s4 + $0x68] sm:$0xff]  ;;  %vm1153_vm2 = vcmask 64512   ;;  %s2957_s27 = smov 16  }
   0xd   : > { %s4536_s25 = smov (!%p269_p3, %s2393_s25), 3  ;;  %2521 = vmatpush3.msk.msra.mxu0 %vm452_vm0, %v280_v0  ;;  %2571 = vmatpush3.msra.mxu1 %v920_v43  ;;  %v917_v49 = vld [vmem:[%s4524_s4 + $0x60] sm:$0xff]  ;;  %v916_v53 = vld [vmem:[%s4524_s4 + $0x58] sm:$0xff]  ;;  %v915_v59 = vld [vmem:[%s4524_s4 + $0x50] sm:$0xff]  ;;  %s2958_s28 = smov 24   ;;  %vm1858_vm3 = vcmask 130048  }
   0xe   : > { %s2438_s26 = sshll.u32 %s4536_s25, 3  ;;  %2572 = vmatprep.subr.mxu1 %v919_v44  ;;  %v914_v63 = vld [vmem:[%s4524_s4 + $0x48] sm:$0xff]  ;;  %vm1891_vm4 = vcmask 195584   ;;  %s2650_s9 = smul.u32 72, %s4536_s25 }
   0xf   : > { %s273_s8 = scalar_lea.vmem %s4520_s0, %s2438_s26  ;;  %2573 = vmatpush3.msra.mxu1 %v919_v44  ;;  %s2956_s26 = smov 8  }
  0x10   : > { %v279_v1 = vld [vmem:[%s273_s8] sm:$0xff]  ;;  %2574 = vmatprep.subr.mxu1 %v918_v45  ;;  %s4487_s25 = scalar_lea.vmem %s4527_s7, %s2650_s9 }
  0x11   : > { %291 = vxpose.xlu0.b32.start.end [1/1] (short) %v279_v1, 128  ;;  %v289_v2 = vcombine.high %v279_v1, %v279_v1  ;;  %2575 = vmatpush3.msra.mxu1 %v918_v45 }
  0x12   : > { %2576 = vmatprep.subr.mxu1 %v917_v49 }
  0x13   : > { %2577 = vmatpush3.msra.mxu1 %v917_v49 }
  0x14   : > { %2578 = vmatprep.subr.mxu1 %v916_v53 }
  0x15   : > { %2579 = vmatpush3.msra.mxu1 %v916_v53 }
  0x16   : > { %2580 = vmatprep.subr.mxu1 %v915_v59 }
  0x17   : > { %2581 = vmatpush3.msra.mxu1 %v915_v59 }
  0x18   : > { %2582 = vmatprep.subr.mxu1 %v914_v63 }
  0x19   : > { %2583 = vmatpush3.msra.mxu1 %v914_v63 }
  0x4e   : > { %323 = vxpose.xlu0.b32.start.end [1/1] (short) %v289_v2, 128  ;;  %v913_v2 = vld [vmem:[%s4524_s4 + $0x40] sm:$0xff] }
  0x4f   : > { %2584 = vmatprep.subr.mxu1 %v913_v2 }
  0x50   : > { %2585 = vmatpush3.msra.mxu1 %v913_v2 }
  0x8d   : > { %v307_v3 = vpop.trf.xlu0 }
  0x8e   : > { %2522 = vmatprep.mubr.msk.f32.mxu0 %vm355_vm1, %v307_v3  ;;  %v912_v3 = vld [vmem:[%s4524_s4 + $0x38] sm:$0xff] }
  0x8f   : > { %2586 = vmatprep.subr.mxu1 %v912_v3 }
  0x90   : > { %2587 = vmatpush3.msra.mxu1 %v912_v3 }
  0x91   : > { %v308_v4 = vpop.trf.xlu0 }
  0x92   : > { %2523 = vmatmul.mubr.msk.f32.vlgmr.msra.gmra.mxu0 %vm355_vm1, %v308_v4 }
  0x95   : > { %v309_v5 = vpop.trf.xlu0 }
  0x96   : > { %2525 = vmatprep.mubr.msk.f32.mxu0 %vm355_vm1, %v309_v5 }
  0x99   : > { %v310_v6 = vpop.trf.xlu0 }
  0x9a   : > { %2526 = vmatmul.mubr.msk.f32.gmra.mxu0 %vm355_vm1, %v310_v6 }
  0x9d   : > { %v311_v7 = vpop.trf.xlu0 }
  0x9e   : > { %2528 = vmatprep.mubr.msk.f32.mxu0 %vm355_vm1, %v311_v7  ;;  %v911_v7 = vld [vmem:[%s4524_s4 + $0x30] sm:$0xff] }
  0x9f   : > { %2588 = vmatprep.subr.mxu1 %v911_v7 }
  0xa0   : > { %2589 = vmatpush3.msra.mxu1 %v911_v7 }
  0xa1   : > { %v312_v8 = vpop.trf.xlu0 }
  0xa2   : > { %2529 = vmatmul.mubr.msk.f32.gmra.mxu0 %vm355_vm1, %v312_v8 }
  0xa5   : > { %v313_v9 = vpop.trf.xlu0 }
  0xa6   : > { %2531 = vmatprep.mubr.msk.f32.mxu0 %vm355_vm1, %v313_v9 }
  0xa9   : > { %v314_v10 = vpop.trf.xlu0 }
  0xaa   : > { %2532 = vmatmul.mubr.msk.f32.gmra.mxu0 %vm355_vm1, %v314_v10 }
  0xad   : > { %v315_v11 = vpop.trf.xlu0 }
  0xae   : > { %2534 = vmatprep.mubr.msk.f32.mxu0 %vm355_vm1, %v315_v11  ;;  %v910_v11 = vld [vmem:[%s4524_s4 + $0x28] sm:$0xff] }
  0xaf   : > { %2590 = vmatprep.subr.mxu1 %v910_v11 }
  0xb0   : > { %2591 = vmatpush3.msra.mxu1 %v910_v11 }
  0xb1   : > { %v316_v12 = vpop.trf.xlu0 }
  0xb2   : > { %2535 = vmatmul.mubr.msk.f32.gmra.mxu0 %vm355_vm1, %v316_v12 }
  0xb5   : > { %v317_v13 = vpop.trf.xlu0 }
  0xb6   : > { %2537 = vmatprep.mubr.msk.f32.mxu0 %vm355_vm1, %v317_v13 }
  0xb9   : > { %v318_v14 = vpop.trf.xlu0 }
  0xba   : > { %2538 = vmatmul.mubr.msk.f32.gmra.mxu0 %vm355_vm1, %v318_v14  ;;  %v909_v14 = vld [vmem:[%s4524_s4 + $0x20] sm:$0xff] }
  0xbb   : > { %2592 = vmatprep.subr.mxu1 %v909_v14 }
  0xbc   : > { %2593 = vmatpush3.msra.mxu1 %v909_v14 }
  0xbd   : > { %v319_v15 = vpop.trf.xlu0 }
  0xbe   : > { %2540 = vmatprep.mubr.msk.f32.mxu0 %vm355_vm1, %v319_v15  ;;  %v908_v15 = vld [vmem:[%s4524_s4 + $0x18] sm:$0xff] }
  0xbf   : > { %2594 = vmatprep.subr.mxu1 %v908_v15 }
  0xc0   : > { %2595 = vmatpush3.msra.mxu1 %v908_v15 }
  0xc1   : > { %v320_v16 = vpop.trf.xlu0 }
  0xc2   : > { %2541 = vmatmul.mubr.msk.f32.gmra.mxu0 %vm355_vm1, %v320_v16 }
  0xc5   : > { %v321_v17 = vpop.trf.xlu0 }
  0xc6   : > { %2543 = vmatprep.mubr.msk.f32.mxu0 %vm355_vm1, %v321_v17 }
  0xc9   : > { %v322_v18 = vpop.trf.xlu0 }
  0xca   : > { %2544 = vmatmul.mubr.msk.f32.gmra.mxu0 %vm355_vm1, %v322_v18 }
  0xcd   : > { %v339_v19 = vpop.trf.xlu0 }
  0xce   : > { %2546 = vmatprep.mubr.msk.f32.mxu0 %vm355_vm1, %v339_v19  ;;  %v907_v19 = vld [vmem:[%s4524_s4 + $0x10] sm:$0xff] }
  0xcf   : > { %2596 = vmatprep.subr.mxu1 %v907_v19 }
  0xd0   : > { %2597 = vmatpush3.msra.mxu1 %v907_v19 }
  0xd1   : > { %v340_v20 = vpop.trf.xlu0 }
  0xd2   : > { %2547 = vmatmul.mubr.msk.f32.gmra.mxu0 %vm355_vm1, %v340_v20 }
  0xd5   : > { %v341_v21 = vpop.trf.xlu0 }
  0xd6   : > { %2549 = vmatprep.mubr.msk.f32.mxu0 %vm355_vm1, %v341_v21 }
  0xd9   : > { %v342_v22 = vpop.trf.xlu0 }
  0xda   : > { %2550 = vmatmul.mubr.msk.f32.gmra.mxu0 %vm355_vm1, %v342_v22 }
  0xdd   : > { %v343_v23 = vpop.trf.xlu0 }
  0xde   : > { %2552 = vmatprep.mubr.msk.f32.mxu0 %vm355_vm1, %v343_v23  ;;  %v906_v23 = vld [vmem:[%s4524_s4 + $0x8] sm:$0xff] }
  0xdf   : > { %2598 = vmatprep.subr.mxu1 %v906_v23 }
  0xe0   : > { %2599 = vmatpush3.msra.mxu1 %v906_v23 }
  0xe1   : > { %v344_v24 = vpop.trf.xlu0 }
  0xe2   : > { %2553 = vmatmul.mubr.msk.f32.gmra.mxu0 %vm355_vm1, %v344_v24 }
  0xe5   : > { %v345_v25 = vpop.trf.xlu0 }
  0xe6   : > { %2555 = vmatprep.mubr.msk.f32.mxu0 %vm355_vm1, %v345_v25 }
  0xe9   : > { %v346_v26 = vpop.trf.xlu0 }
  0xea   : > { %2556 = vmatmul.mubr.msk.f32.gmra.mxu0 %vm355_vm1, %v346_v26  ;;  %v905_v26 = vld [vmem:[%s4524_s4] sm:$0xff] }
  0xeb   : > { %2600 = vmatprep.subr.mxu1 %v905_v26 }
  0xec   : > { %2601 = vmatpush3.msra.mxu1 %v905_v26  ;;  %v2955_v26 = vmov 1.0  }
  0xed   : > { %v347_v27 = vpop.trf.xlu0  ;;  %2052 = vmatprep.subr.mxu0 %v2955_v26 }
  0xee   : > { %2558 = vmatprep.mubr.msk.f32.mxu0 %vm355_vm1, %v347_v27 }
  0xf1   : > { %v348_v28 = vpop.trf.xlu0 }
  0xf2   : > { %2559 = vmatmul.mubr.msk.f32.gmra.mxu0 %vm355_vm1, %v348_v28 }
  0xf5   : > { %v349_v29 = vpop.trf.xlu0 }
  0xf6   : > { %2561 = vmatprep.mubr.msk.f32.mxu0 %vm355_vm1, %v349_v29 }
  0xf9   : > { %v350_v30 = vpop.trf.xlu0 }
  0xfa   : > { %2562 = vmatmul.mubr.msk.f32.gmra.mxu0 %vm355_vm1, %v350_v30 }
  0xfd   : > { %v351_v31 = vpop.trf.xlu0 }
  0xfe   : > { %2564 = vmatprep.mubr.msk.f32.mxu0 %vm355_vm1, %v351_v31 }
 0x101   : > { %v352_v32 = vpop.trf.xlu0 }
 0x102   : > { %2565 = vmatmul.mubr.msk.f32.gmra.mxu0 %vm355_vm1, %v352_v32 }
 0x105   : > { %v353_v33 = vpop.trf.xlu0 }
 0x106   : > { %2567 = vmatprep.mubr.msk.f32.mxu0 %vm355_vm1, %v353_v33 }
 0x109   : > { %v354_v34 = vpop.trf.xlu0 }
 0x10a   : > { %2568 = vmatmul.mubr.msk.f32.gmra.mxu0 %vm355_vm1, %v354_v34 }
 0x152   : > { %v2524_v36 = vpop.f32.mrf.mxu0 }
 0x153   : > { %v528_v37 = vadd.f32 %v2524_v36, %v3052_v35 }
 0x154   : > { %v522_v38 = vpop.f32.mrf.mxu0 }
 0x155   : > { %v3055_v39 = vmax.f32 %v528_v37, 0.0  ;;  %v523_v40 = vadd.f32 %v3052_v35, %v522_v38 }
 0x157   : > { %v3058_v41 = vmax.f32 %v523_v40, 0.0  ;;  %v714_v42 = vmul.f32 %v3055_v39, %v3055_v39 }
 0x159   : > { %747 = vadd.xlane.f32.xlu1 %v714_v42  ;;  %v713_v48 = vmul.f32 %v3058_v41, %v3058_v41 }
 0x15a   : > { %v2527_v46 = vpop.f32.mrf.mxu0 }
 0x15b   : > { %v538_v47 = vadd.f32 %v2527_v46, %v3052_v35 }
 0x15c   : > { %v532_v50 = vpop.f32.mrf.mxu0 }
 0x15d   : > { %v3077_v51 = vmax.f32 %v538_v47, 0.0  ;;  %v533_v52 = vadd.f32 %v3052_v35, %v532_v50  ;;  %745 = vadd.xlane.f32.xlu1 %v713_v48 }
 0x15f   : > { %v3083_v54 = vmax.f32 %v533_v52, 0.0  ;;  %v716_v55 = vmul.f32 %v3077_v51, %v3077_v51 }
 0x161   : > { %751 = vadd.xlane.f32.xlu1 %v716_v55  ;;  %v715_v58 = vmul.f32 %v3083_v54, %v3083_v54 }
 0x162   : > { %v2530_v56 = vpop.f32.mrf.mxu0 }
 0x163   : > { %v548_v57 = vadd.f32 %v2530_v56, %v3052_v35 }
 0x164   : > { %v542_v60 = vpop.f32.mrf.mxu0 }
 0x165   : > { %v3093_v61 = vmax.f32 %v548_v57, 0.0  ;;  %v543_v62 = vadd.f32 %v3052_v35, %v542_v60  ;;  %749 = vadd.xlane.f32.xlu1 %v715_v58 }
 0x167   : > { %v3099_v0 = vmax.f32 %v543_v62, 0.0  ;;  %v718_v1 = vmul.f32 %v3093_v61, %v3093_v61 }
 0x169   : > { %755 = vadd.xlane.f32.xlu1 %v718_v1  ;;  %v717_v6 = vmul.f32 %v3099_v0, %v3099_v0 }
 0x16a   : > { %v2533_v4 = vpop.f32.mrf.mxu0 }
 0x16b   : > { %v558_v5 = vadd.f32 %v2533_v4, %v3052_v35 }
 0x16c   : > { %v552_v8 = vpop.f32.mrf.mxu0 }
 0x16d   : > { %v3115_v9 = vmax.f32 %v558_v5, 0.0  ;;  %v553_v10 = vadd.f32 %v3052_v35, %v552_v8  ;;  %753 = vadd.xlane.f32.xlu1 %v717_v6 }
 0x16f   : > { %v3121_v12 = vmax.f32 %v553_v10, 0.0  ;;  %v720_v13 = vmul.f32 %v3115_v9, %v3115_v9 }
 0x171   : > { %759 = vadd.xlane.f32.xlu1 %v720_v13  ;;  %v719_v18 = vmul.f32 %v3121_v12, %v3121_v12 }
 0x172   : > { %v2536_v16 = vpop.f32.mrf.mxu0 }
 0x173   : > { %v568_v17 = vadd.f32 %v2536_v16, %v3052_v35 }
 0x174   : > { %v562_v20 = vpop.f32.mrf.mxu0 }
 0x175   : > { %v3137_v21 = vmax.f32 %v568_v17, 0.0  ;;  %v563_v22 = vadd.f32 %v3052_v35, %v562_v20  ;;  %757 = vadd.xlane.f32.xlu1 %v719_v18 }
 0x177   : > { %v3143_v24 = vmax.f32 %v563_v22, 0.0  ;;  %v722_v25 = vmul.f32 %v3137_v21, %v3137_v21 }
 0x179   : > { %763 = vadd.xlane.f32.xlu1 %v722_v25  ;;  %v721_v29 = vmul.f32 %v3143_v24, %v3143_v24 }
 0x17a   : > { %v2539_v27 = vpop.f32.mrf.mxu0 }
 0x17b   : > { %v578_v28 = vadd.f32 %v2539_v27, %v3052_v35 }
 0x17c   : > { %v572_v30 = vpop.f32.mrf.mxu0 }
 0x17d   : > { %v3153_v31 = vmax.f32 %v578_v28, 0.0  ;;  %v573_v32 = vadd.f32 %v3052_v35, %v572_v30  ;;  %761 = vadd.xlane.f32.xlu1 %v721_v29 }
 0x17f   : > { %v3156_v33 = vmax.f32 %v573_v32, 0.0  ;;  %v724_v34 = vmul.f32 %v3153_v31, %v3153_v31 }
 0x181   : > { %767 = vadd.xlane.f32.xlu1 %v724_v34  ;;  %v723_v38 = vmul.f32 %v3156_v33, %v3156_v33 }
 0x182   : > { %v2542_v36 = vpop.f32.mrf.mxu0 }
 0x183   : > { %v588_v37 = vadd.f32 %v2542_v36, %v3052_v35 }
 0x184   : > { %v582_v40 = vpop.f32.mrf.mxu0 }
 0x185   : > { %v3163_v42 = vmax.f32 %v588_v37, 0.0  ;;  %v583_v43 = vadd.f32 %v3052_v35, %v582_v40  ;;  %765 = vadd.xlane.f32.xlu1 %v723_v38 }
 0x187   : > { %v3166_v44 = vmax.f32 %v583_v43, 0.0  ;;  %v726_v45 = vmul.f32 %v3163_v42, %v3163_v42 }
 0x189   : > { %771 = vadd.xlane.f32.xlu1 %v726_v45  ;;  %v725_v48 = vmul.f32 %v3166_v44, %v3166_v44 }
 0x18a   : > { %v2545_v46 = vpop.f32.mrf.mxu0 }
 0x18b   : > { %v598_v47 = vadd.f32 %v2545_v46, %v3052_v35 }
 0x18c   : > { %v592_v49 = vpop.f32.mrf.mxu0 }
 0x18d   : > { %v3173_v50 = vmax.f32 %v598_v47, 0.0  ;;  %v593_v52 = vadd.f32 %v3052_v35, %v592_v49  ;;  %769 = vadd.xlane.f32.xlu1 %v725_v48 }
 0x18f   : > { %v3176_v53 = vmax.f32 %v593_v52, 0.0  ;;  %v728_v55 = vmul.f32 %v3173_v50, %v3173_v50 }
 0x191   : > { %775 = vadd.xlane.f32.xlu1 %v728_v55  ;;  %v727_v58 = vmul.f32 %v3176_v53, %v3176_v53 }
 0x192   : > { %v2548_v56 = vpop.f32.mrf.mxu0 }
 0x193   : > { %v608_v57 = vadd.f32 %v2548_v56, %v3052_v35 }
 0x194   : > { %v602_v59 = vpop.f32.mrf.mxu0 }
 0x195   : > { %v3183_v60 = vmax.f32 %v608_v57, 0.0  ;;  %v603_v62 = vadd.f32 %v3052_v35, %v602_v59  ;;  %773 = vadd.xlane.f32.xlu1 %v727_v58 }
 0x197   : > { %v3186_v63 = vmax.f32 %v603_v62, 0.0  ;;  %v730_v1 = vmul.f32 %v3183_v60, %v3183_v60 }
 0x199   : > { %779 = vadd.xlane.f32.xlu0 %v730_v1  ;;  %v729_v2 = vmul.f32 %v3186_v63, %v3186_v63 }
 0x19a   : > { %v2551_v3 = vpop.f32.mrf.mxu0 }
 0x19b   : > { %v618_v4 = vadd.f32 %v2551_v3, %v3052_v35  ;;  %777 = vadd.xlane.f32.xlu1 %v729_v2 }
 0x19c   : > { %v612_v5 = vpop.f32.mrf.mxu0 }
 0x19d   : > { %v3193_v6 = vmax.f32 %v618_v4, 0.0  ;;  %v613_v7 = vadd.f32 %v3052_v35, %v612_v5 }
 0x19f   : > { %v3196_v8 = vmax.f32 %v613_v7, 0.0  ;;  %v732_v10 = vmul.f32 %v3193_v6, %v3193_v6 }
 0x1a1   : > { %783 = vadd.xlane.f32.xlu1 %v732_v10  ;;  %v731_v11 = vmul.f32 %v3196_v8, %v3196_v8 }
 0x1a2   : > { %v2554_v13 = vpop.f32.mrf.mxu0 }
 0x1a3   : > { %v628_v14 = vadd.f32 %v2554_v13, %v3052_v35 }
 0x1a4   : > { %v622_v15 = vpop.f32.mrf.mxu0 }
 0x1a5   : > { %v3203_v16 = vmax.f32 %v628_v14, 0.0  ;;  %781 = vadd.xlane.f32.xlu1 %v731_v11  ;;  %v623_v17 = vadd.f32 %v3052_v35, %v622_v15 }
 0x1a7   : > { %v3206_v18 = vmax.f32 %v623_v17, 0.0  ;;  %v734_v19 = vmul.f32 %v3203_v16, %v3203_v16 }
 0x1a9   : > { %787 = vadd.xlane.f32.xlu1 %v734_v19  ;;  %v733_v20 = vmul.f32 %v3206_v18, %v3206_v18 }
 0x1aa   : > { %v2557_v22 = vpop.f32.mrf.mxu0 }
 0x1ab   : > { %v638_v23 = vadd.f32 %v2557_v22, %v3052_v35 }
 0x1ac   : > { %v632_v25 = vpop.f32.mrf.mxu0 }
 0x1ad   : > { %v3214_v27 = vmax.f32 %v638_v23, 0.0  ;;  %785 = vadd.xlane.f32.xlu1 %v733_v20  ;;  %v633_v28 = vadd.f32 %v3052_v35, %v632_v25 }
 0x1af   : > { %v3217_v29 = vmax.f32 %v633_v28, 0.0  ;;  %v736_v30 = vmul.f32 %v3214_v27, %v3214_v27 }
 0x1b1   : > { %791 = vadd.xlane.f32.xlu1 %v736_v30  ;;  %v735_v32 = vmul.f32 %v3217_v29, %v3217_v29 }
 0x1b2   : > { %v2560_v34 = vpop.f32.mrf.mxu0 }
 0x1b3   : > { %v648_v36 = vadd.f32 %v2560_v34, %v3052_v35 }
 0x1b4   : > { %v642_v37 = vpop.f32.mrf.mxu0 }
 0x1b5   : > { %v3224_v38 = vmax.f32 %v648_v36, 0.0  ;;  %789 = vadd.xlane.f32.xlu1 %v735_v32  ;;  %v643_v40 = vadd.f32 %v3052_v35, %v642_v37 }
 0x1b7   : > { %v3227_v43 = vmax.f32 %v643_v40, 0.0  ;;  %v738_v45 = vmul.f32 %v3224_v38, %v3224_v38 }
 0x1b9   : > { %795 = vadd.xlane.f32.xlu1 %v738_v45  ;;  %v737_v46 = vmul.f32 %v3227_v43, %v3227_v43 }
 0x1ba   : > { %v2563_v47 = vpop.f32.mrf.mxu0 }
 0x1bb   : > { %v658_v48 = vadd.f32 %v2563_v47, %v3052_v35 }
 0x1bc   : > { %v652_v49 = vpop.f32.mrf.mxu0 }
 0x1bd   : > { %v3234_v52 = vmax.f32 %v658_v48, 0.0  ;;  %793 = vadd.xlane.f32.xlu1 %v737_v46  ;;  %v653_v55 = vadd.f32 %v3052_v35, %v652_v49 }
 0x1bf   : > { %v3237_v56 = vmax.f32 %v653_v55, 0.0  ;;  %v740_v57 = vmul.f32 %v3234_v52, %v3234_v52 }
 0x1c1   : > { %799 = vadd.xlane.f32.xlu1 %v740_v57  ;;  %v739_v58 = vmul.f32 %v3237_v56, %v3237_v56 }
 0x1c2   : > { %v2566_v59 = vpop.f32.mrf.mxu0 }
 0x1c3   : > { %v668_v62 = vadd.f32 %v2566_v59, %v3052_v35 }
 0x1c4   : > { %v662_v1 = vpop.f32.mrf.mxu0 }
 0x1c5   : > { %v3244_v2 = vmax.f32 %v668_v62, 0.0  ;;  %797 = vadd.xlane.f32.xlu1 %v739_v58  ;;  %v663_v3 = vadd.f32 %v3052_v35, %v662_v1 }
 0x1c7   : > { %v3247_v4 = vmax.f32 %v663_v3, 0.0  ;;  %v742_v5 = vmul.f32 %v3244_v2, %v3244_v2 }
 0x1c9   : > { %803 = vadd.xlane.f32.xlu1 %v742_v5  ;;  %v741_v7 = vmul.f32 %v3247_v4, %v3247_v4 }
 0x1ca   : > { %v2569_v10 = vpop.f32.mrf.mxu0 }
 0x1cb   : > { %v678_v11 = vadd.f32 %v2569_v10, %v3052_v35 }
 0x1cc   : > { %v672_v13 = vpop.f32.mrf.mxu0 }
 0x1cd   : > { %v673_v14 = vadd.f32 %v3052_v35, %v672_v13  ;;  %801 = vadd.xlane.f32.xlu1 %v741_v7  ;;  %v3255_v15 = vmax.f32 %v678_v11, 0.0 }
 0x1cf   : > { %v3257_v17 = vmax.f32 %v673_v14, 0.0  ;;  %v744_v20 = vmul.f32 %v3255_v15, %v3255_v15 }
 0x1d1   : > { %v743_v19 = vmul.f32 %v3257_v17, %v3257_v17 }
 0x1d3   : > { %805 = vadd.xlane.f32.xlu1 %v743_v19 }
 0x1d7   : > { %807 = vadd.xlane.f32.xlu1 %v744_v20 }
 0x1e2   : > { %v748_v22 = vpop.xlane.xlu1 %747 }
 0x1e3   : > { %v810_v23 = vmax.f32 %v748_v22, 1e-24 }
 0x1e5   : > { %2719 = vrsqrt.f32 %v810_v23 }
 0x1e6   : > { %v746_v25 = vpop.xlane.xlu1 %745 }
 0x1e7   : > { %v809_v28 = vmax.f32 %v746_v25, 1e-24 }
 0x1e9   : > { %2721 = vrsqrt.f32 %v809_v28 }
 0x1ea   : > { %v752_v35 = vpop.xlane.xlu1 %751 }
 0x1eb   : > { %v812_v30 = vmax.f32 %v752_v35, 1e-24 }
 0x1ed   : > { %2723 = vrsqrt.f32 %v812_v30 }
 0x1ee   : > { %v750_v32 = vpop.xlane.xlu1 %749 }
 0x1ef   : > { %v811_v34 = vmax.f32 %v750_v32, 1e-24 }
 0x1f1   : > { %2725 = vrsqrt.f32 %v811_v34 }
 0x1f2   : > { %v756_v36 = vpop.xlane.xlu1 %755  ;;  %v2720_v40 = vpop.eup %2719 }
 0x1f3   : > { %v814_v37 = vmax.f32 %v756_v36, 1e-24  ;;  %v3267_v49 = vmul.f32 %v2720_v40, %v3055_v39 }
 0x1f5   : > { %2727 = vrsqrt.f32 %v814_v37 }
 0x1f6   : > { %v2722_v45 = vpop.eup %2721  ;;  %v754_v46 = vpop.xlane.xlu1 %753 }
 0x1f7   : > { %v813_v47 = vmax.f32 %v754_v46, 1e-24  ;;  %v3264_v48 = vmul.f32 %v2722_v45, %v3058_v41 }
 0x1f9   : > { %2729 = vrsqrt.f32 %v813_v47  ;;  %2602 = vmatprep.mubr.f32.mxu1 %v3264_v48 }
 0x1fa   : > { %2603 = vmatmul.mubr.f32.vlgmr.msra.gmra.mxu1 %v3267_v49  ;;  %v760_v55 = vpop.xlane.xlu1 %759  ;;  %v2724_v58 = vpop.eup %2723 }
 0x1fb   : > { %v816_v57 = vmax.f32 %v760_v55, 1e-24  ;;  %v3275_v41 = vmul.f32 %v2724_v58, %v3077_v51 }
 0x1fd   : > { %2731 = vrsqrt.f32 %v816_v57 }
 0x1fe   : > { %v2726_v59 = vpop.eup %2725  ;;  %v758_v62 = vpop.xlane.xlu1 %757 }
 0x1ff   : > { %v815_v1 = vmax.f32 %v758_v62, 1e-24  ;;  %v3272_v3 = vmul.f32 %v2726_v59, %v3083_v54 }
 0x201   : > { %2733 = vrsqrt.f32 %v815_v1  ;;  %2605 = vmatprep.mubr.f32.mxu1 %v3272_v3 }
 0x202   : > { %2606 = vmatmul.mubr.f32.gmra.mxu1 %v3275_v41  ;;  %v764_v39 = vpop.xlane.xlu1 %763  ;;  %v2728_v7 = vpop.eup %2727 }
 0x203   : > { %v818_v5 = vmax.f32 %v764_v39, 1e-24  ;;  %v3283_v54 = vmul.f32 %v2728_v7, %v3093_v61 }
 0x205   : > { %2735 = vrsqrt.f32 %v818_v5 }
 0x206   : > { %v2730_v10 = vpop.eup %2729  ;;  %v762_v11 = vpop.xlane.xlu1 %761 }
 0x207   : > { %v817_v13 = vmax.f32 %v762_v11, 1e-24  ;;  %v3280_v14 = vmul.f32 %v2730_v10, %v3099_v0 }
 0x209   : > { %2737 = vrsqrt.f32 %v817_v13  ;;  %2608 = vmatprep.mubr.f32.mxu1 %v3280_v14 }
 0x20a   : > { %2609 = vmatmul.mubr.f32.gmra.mxu1 %v3283_v54  ;;  %v768_v51 = vpop.xlane.xlu1 %767  ;;  %v2732_v20 = vpop.eup %2731 }
 0x20b   : > { %v820_v19 = vmax.f32 %v768_v51, 1e-24  ;;  %v3291_v0 = vmul.f32 %v2732_v20, %v3115_v9 }
 0x20d   : > { %2739 = vrsqrt.f32 %v820_v19 }
 0x20e   : > { %v2734_v22 = vpop.eup %2733  ;;  %v766_v23 = vpop.xlane.xlu1 %765 }
 0x20f   : > { %v819_v25 = vmax.f32 %v766_v23, 1e-24  ;;  %v3288_v28 = vmul.f32 %v2734_v22, %v3121_v12 }
 0x211   : > { %2741 = vrsqrt.f32 %v819_v25  ;;  %2611 = vmatprep.mubr.f32.mxu1 %v3288_v28 }
 0x212   : > { %2612 = vmatmul.mubr.f32.gmra.mxu1 %v3291_v0  ;;  %v772_v61 = vpop.xlane.xlu1 %771  ;;  %v2736_v30 = vpop.eup %2735 }
 0x213   : > { %v822_v35 = vmax.f32 %v772_v61, 1e-24  ;;  %v3299_v12 = vmul.f32 %v2736_v30, %v3137_v21 }
 0x215   : > { %2743 = vrsqrt.f32 %v822_v35 }
 0x216   : > { %v2738_v32 = vpop.eup %2737  ;;  %v770_v34 = vpop.xlane.xlu1 %769 }
 0x217   : > { %v821_v36 = vmax.f32 %v770_v34, 1e-24  ;;  %v3296_v37 = vmul.f32 %v2738_v32, %v3143_v24 }
 0x219   : > { %2745 = vrsqrt.f32 %v821_v36  ;;  %2614 = vmatprep.mubr.f32.mxu1 %v3296_v37 }
 0x21a   : > { %2615 = vmatmul.mubr.f32.gmra.mxu1 %v3299_v12  ;;  %v776_v9 = vpop.xlane.xlu1 %775  ;;  %v2740_v45 = vpop.eup %2739 }
 0x21b   : > { %v824_v40 = vmax.f32 %v776_v9, 1e-24  ;;  %v884_v24 = vmul.f32 %v2740_v45, %v3153_v31 }
 0x21d   : > { %2747 = vrsqrt.f32 %v824_v40 }
 0x21e   : > { %v2742_v46 = vpop.eup %2741  ;;  %v774_v47 = vpop.xlane.xlu1 %773 }
 0x21f   : > { %v823_v55 = vmax.f32 %v774_v47, 1e-24  ;;  %v883_v57 = vmul.f32 %v2742_v46, %v3156_v33 }
 0x221   : > { %2749 = vrsqrt.f32 %v823_v55  ;;  %2617 = vmatprep.mubr.f32.mxu1 %v883_v57 }
 0x222   : > { %2618 = vmatmul.mubr.f32.gmra.mxu1 %v884_v24  ;;  %v780_v21 = vpop.xlane.xlu0 %779  ;;  %v2744_v62 = vpop.eup %2743 }
 0x223   : > { %v826_v58 = vmax.f32 %v780_v21, 1e-24  ;;  %v886_v7 = vmul.f32 %v2744_v62, %v3163_v42 }
 0x224   : > { %v778_v59 = vpop.xlane.xlu1 %777 }
 0x225   : > { %v825_v1 = vmax.f32 %v778_v59, 1e-24  ;;  %2751 = vrsqrt.f32 %v826_v58 }
 0x226   : > { %v2746_v39 = vpop.eup %2745 }
 0x227   : > { %2753 = vrsqrt.f32 %v825_v1  ;;  %v885_v5 = vmul.f32 %v2746_v39, %v3166_v44 }
 0x229   : > { %2620 = vmatprep.mubr.f32.mxu1 %v885_v5 }
 0x22a   : > { %v2748_v10 = vpop.eup %2747  ;;  %2621 = vmatmul.mubr.f32.gmra.mxu1 %v886_v7  ;;  %v784_v33 = vpop.xlane.xlu1 %783 }
 0x22b   : > { %v888_v31 = vmul.f32 %v2748_v10, %v3173_v50  ;;  %v828_v11 = vmax.f32 %v784_v33, 1e-24 }
 0x22d   : > { %2053 = vmatpush1.msra.mxu0 %v888_v31  ;;  %2755 = vrsqrt.f32 %v828_v11 }
 0x22e   : > { %v2750_v13 = vpop.eup %2749  ;;  %v782_v51 = vpop.xlane.xlu1 %781  ;;  %2054 = vmatprep.subr.mxu0 %v2955_v26 }
 0x22f   : > { %v827_v19 = vmax.f32 %v782_v51, 1e-24  ;;  %v887_v20 = vmul.f32 %v2750_v13, %v3176_v53 }
 0x231   : > { %2757 = vrsqrt.f32 %v827_v19  ;;  %2623 = vmatprep.mubr.f32.mxu1 %v887_v20  ;;  %2055 = vmatpush1.msra.mxu0 %v887_v20 }
 0x232   : > { %2624 = vmatmul.mubr.f32.gmra.mxu1 %v888_v31  ;;  %2056 = vmatprep.subr.mxu0 %v2955_v26  ;;  %v788_v42 = vpop.xlane.xlu1 %787  ;;  %v2752_v44 = vpop.eup %2751 }
 0x233   : > { %2057 = vmatpush1.msra.mxu0 %v886_v7  ;;  %v830_v22 = vmax.f32 %v788_v42, 1e-24  ;;  %v3317_v25 = vmul.f32 %v2752_v44, %v3183_v60 }
 0x234   : > { %v2754_v50 = vpop.eup %2753  ;;  %2058 = vmatprep.subr.mxu0 %v2955_v26 }
 0x235   : > { %2059 = vmatpush1.msra.mxu0 %v885_v5  ;;  %v3313_v23 = vmul.f32 %v2754_v50, %v3186_v63  ;;  %2759 = vrsqrt.f32 %v830_v22 }
 0x236   : > { %2060 = vmatprep.subr.mxu0 %v2955_v26  ;;  %v786_v53 = vpop.xlane.xlu1 %785 }
 0x237   : > { %v829_v61 = vmax.f32 %v786_v53, 1e-24  ;;  %2626 = vmatprep.mubr.f32.mxu1 %v3313_v23  ;;  %2061 = vmatpush1.msra.mxu0 %v884_v24 }
 0x238   : > { %2627 = vmatmul.mubr.f32.gmra.mxu1 %v3317_v25  ;;  %2062 = vmatprep.subr.mxu0 %v2955_v26 }
 0x239   : > { %2761 = vrsqrt.f32 %v829_v61  ;;  %2063 = vmatpush1.msra.mxu0 %v883_v57 }
 0x23a   : > { %2064 = vmatprep.subr.mxu0 %v2955_v26  ;;  %v792_v63 = vpop.xlane.xlu1 %791  ;;  %v2756_v60 = vpop.eup %2755 }
 0x23b   : > { %2065 = vmatpush1.msra.mxu0 %v3299_v12  ;;  %v832_v35 = vmax.f32 %v792_v63, 1e-24  ;;  %v3333_v12 = vmul.f32 %v2756_v60, %v3193_v6 }
 0x23c   : > { %2066 = vmatprep.subr.mxu0 %v2955_v26 }
 0x23d   : > { %2067 = vmatpush1.msra.mxu0 %v3296_v37  ;;  %2763 = vrsqrt.f32 %v832_v35 }
 0x23e   : > { %v2758_v30 = vpop.eup %2757  ;;  %2068 = vmatprep.subr.mxu0 %v2955_v26  ;;  %v790_v32 = vpop.xlane.xlu1 %789 }
 0x23f   : > { %v831_v34 = vmax.f32 %v790_v32, 1e-24  ;;  %2069 = vmatpush1.msra.mxu0 %v3291_v0  ;;  %v3329_v36 = vmul.f32 %v2758_v30, %v3196_v8 }
 0x240   : > { %2070 = vmatprep.subr.mxu0 %v2955_v26 }
 0x241   : > { %2765 = vrsqrt.f32 %v831_v34  ;;  %2629 = vmatprep.mubr.f32.mxu1 %v3329_v36  ;;  %2071 = vmatpush1.msra.mxu0 %v3288_v28 }
 0x242   : > { %2072 = vmatprep.subr.mxu0 %v2955_v26  ;;  %v796_v37 = vpop.xlane.xlu1 %795  ;;  %2630 = vmatmul.mubr.f32.gmra.mxu1 %v3333_v12  ;;  %v2760_v0 = vpop.eup %2759 }
 0x243   : > { %2073 = vmatpush1.msra.mxu0 %v3283_v54  ;;  %v834_v8 = vmax.f32 %v796_v37, 1e-24  ;;  %v3349_v54 = vmul.f32 %v2760_v0, %v3203_v16 }
 0x244   : > { %2074 = vmatprep.subr.mxu0 %v2955_v26 }
 0x245   : > { %2075 = vmatpush1.msra.mxu0 %v3280_v14  ;;  %2767 = vrsqrt.f32 %v834_v8 }
 0x246   : > { %v2762_v6 = vpop.eup %2761  ;;  %2076 = vmatprep.subr.mxu0 %v2955_v26  ;;  %v794_v9 = vpop.xlane.xlu1 %793 }
 0x247   : > { %v833_v40 = vmax.f32 %v794_v9, 1e-24  ;;  %2077 = vmatpush1.msra.mxu0 %v3275_v41  ;;  %v3345_v28 = vmul.f32 %v2762_v6, %v3206_v18 }
 0x248   : > { %2078 = vmatprep.subr.mxu0 %v2955_v26 }
 0x249   : > { %2769 = vrsqrt.f32 %v833_v40  ;;  %2632 = vmatprep.mubr.f32.mxu1 %v3345_v28  ;;  %2079 = vmatpush1.msra.mxu0 %v3272_v3 }
 0x24a   : > { %2080 = vmatprep.subr.mxu0 %v2955_v26  ;;  %v800_v14 = vpop.xlane.xlu1 %799  ;;  %2633 = vmatmul.mubr.f32.gmra.mxu1 %v3349_v54  ;;  %v2764_v41 = vpop.eup %2763 }
 0x24b   : > { %2081 = vmatpush1.msra.mxu0 %v3267_v49  ;;  %v836_v18 = vmax.f32 %v800_v14, 1e-24  ;;  %v896_v47 = vmul.f32 %v2764_v41, %v3214_v27 }
 0x24c   : > { %2082 = vmatprep.subr.mxu0 %v2955_v26 }
 0x24d   : > { %2083 = vmatpush1.msra.mxu0 %v3264_v48  ;;  %2771 = vrsqrt.f32 %v836_v18 }
 0x24e   : > { %v2766_v16 = vpop.eup %2765  ;;  %v798_v45 = vpop.xlane.xlu1 %797  ;;  %2084 = vmatprep.subr.mxu0 %v2955_v26 }
 0x24f   : > { %v835_v46 = vmax.f32 %v798_v45, 1e-24  ;;  %v895_v3 = vmul.f32 %v2766_v16, %v3217_v29 }
 0x251   : > { %2773 = vrsqrt.f32 %v835_v46  ;;  %2635 = vmatprep.mubr.f32.mxu1 %v895_v3 }
 0x252   : > { %v804_v55 = vpop.xlane.xlu1 %803  ;;  %2636 = vmatmul.mubr.f32.gmra.mxu1 %v896_v47  ;;  %v2768_v57 = vpop.eup %2767 }
 0x253   : > { %v838_v49 = vmax.f32 %v804_v55, 1e-24  ;;  %v898_v59 = vmul.f32 %v2768_v57, %v3224_v38 }
 0x255   : > { %2775 = vrsqrt.f32 %v838_v49 }
 0x256   : > { %v2770_v24 = vpop.eup %2769  ;;  %v802_v21 = vpop.xlane.xlu1 %801 }
 0x257   : > { %v837_v58 = vmax.f32 %v802_v21, 1e-24  ;;  %v897_v48 = vmul.f32 %v2770_v24, %v3227_v43 }
 0x259   : > { %2777 = vrsqrt.f32 %v837_v58  ;;  %2638 = vmatprep.mubr.f32.mxu1 %v897_v48 }
 0x25a   : > { %2639 = vmatmul.mubr.f32.gmra.mxu1 %v898_v59  ;;  %v2772_v62 = vpop.eup %2771 }
 0x25b   : > { %v900_v7 = vmul.f32 %v2772_v62, %v3234_v52  ;;  %v3393_v52 = vld [vmem:[%s4525_s5] ss:$0 sm:$0xff] }
 0x25c   : > { %v806_v29 = vpop.xlane.xlu1 %805 }
 0x25d   : > { %v839_v27 = vmax.f32 %v806_v29, 1e-24 }
 0x25e   : > { %v2774_v1 = vpop.eup %2773 }
 0x25f   : > { %2779 = vrsqrt.f32 %v839_v27  ;;  %v899_v39 = vmul.f32 %v2774_v1, %v3237_v56 }
 0x260   : > { %v808_v5 = vpop.xlane.xlu1 %807 }
 0x261   : > { %v840_v10 = vmax.f32 %v808_v5, 1e-24  ;;  %2641 = vmatprep.mubr.f32.mxu1 %v899_v39 }
 0x262   : > { %2642 = vmatmul.mubr.f32.gmra.mxu1 %v900_v7  ;;  %v2776_v43 = vpop.eup %2775 }
 0x263   : > { %2781 = vrsqrt.f32 %v840_v10  ;;  %v902_v31 = vmul.f32 %v2776_v43, %v3244_v2 }
 0x266   : > { %v2778_v33 = vpop.eup %2777 }
 0x267   : > { %v901_v38 = vmul.f32 %v2778_v33, %v3247_v4 }
 0x269   : > { %2644 = vmatprep.mubr.f32.mxu1 %v901_v38 }
 0x26a   : > { %2645 = vmatmul.mubr.f32.gmra.mxu1 %v902_v31 }
 0x26c   : > { %v2780_v11 = vpop.eup %2779 }
 0x26d   : > { %v903_v13 = vmul.f32 %v2780_v11, %v3257_v17 }
 0x26f   : > { %2647 = vmatprep.mubr.f32.mxu1 %v903_v13 }
 0x270   : > { %v2782_v56 = vpop.eup %2781 }
 0x271   : > { %v904_v51 = vmul.f32 %v2782_v56, %v3255_v15 }
 0x273   : > { %2648 = vmatmul.mubr.f32.gmra.mxu1 %v904_v51  ;;  %2085 = vmatpush2.msra.mxu0 %v904_v51 }
 0x274   : > { %2086 = vmatprep.subr.mxu0 %v2955_v26 }
 0x275   : > { %2087 = vmatpush2.msra.mxu0 %v903_v13 }
 0x276   : > { %2088 = vmatprep.subr.mxu0 %v2955_v26 }
 0x277   : > { %2089 = vmatpush2.msra.mxu0 %v902_v31 }
 0x278   : > { %2090 = vmatprep.subr.mxu0 %v2955_v26 }
 0x279   : > { %2091 = vmatpush2.msra.mxu0 %v901_v38 }
 0x27a   : > { %2092 = vmatprep.subr.mxu0 %v2955_v26 }
 0x27b   : > { %2093 = vmatpush2.msra.mxu0 %v900_v7 }
 0x27c   : > { %2094 = vmatprep.subr.mxu0 %v2955_v26 }
 0x27d   : > { %2095 = vmatpush2.msra.mxu0 %v899_v39 }
 0x27e   : > { %2096 = vmatprep.subr.mxu0 %v2955_v26 }
 0x27f   : > { %2097 = vmatpush2.msra.mxu0 %v898_v59 }
 0x280   : > { %2098 = vmatprep.subr.mxu0 %v2955_v26 }
 0x281   : > { %2099 = vmatpush2.msra.mxu0 %v897_v48 }
 0x282   : > { %2100 = vmatprep.subr.mxu0 %v2955_v26 }
 0x283   : > { %2101 = vmatpush2.msra.mxu0 %v896_v47 }
 0x284   : > { %2102 = vmatprep.subr.mxu0 %v2955_v26 }
 0x285   : > { %2103 = vmatpush2.msra.mxu0 %v895_v3 }
 0x286   : > { %2104 = vmatprep.subr.mxu0 %v2955_v26 }
 0x287   : > { %2105 = vmatpush2.msra.mxu0 %v3349_v54 }
 0x288   : > { %2106 = vmatprep.subr.mxu0 %v2955_v26 }
 0x289   : > { %2107 = vmatpush2.msra.mxu0 %v3345_v28 }
 0x28a   : > { %2108 = vmatprep.subr.mxu0 %v2955_v26 }
 0x28b   : > { %2109 = vmatpush2.msra.mxu0 %v3333_v12 }
 0x28c   : > { %2110 = vmatprep.subr.mxu0 %v2955_v26 }
 0x28d   : > { %2111 = vmatpush2.msra.mxu0 %v3329_v36 }
 0x28e   : > { %2112 = vmatprep.subr.mxu0 %v2955_v26 }
 0x28f   : > { %2113 = vmatpush2.msra.mxu0 %v3317_v25 }
 0x290   : > { %2114 = vmatprep.subr.mxu0 %v2955_v26 }
 0x291   : > { %2115 = vmatpush2.msra.mxu0 %v3313_v23 }
 0x2ba   : > { %v2604_v2 = vpop.f32.mrf.mxu1 }
 0x2bb   : > { %v3396_v4 = vadd.f32 %v2604_v2, %v3393_v52 }
 0x2bc   : > { %v994_v15 = vpop.f32.mrf.mxu1 }
 0x2bd   : > { %v3399_v17 = vadd.f32 %v3393_v52, %v994_v15  ;;  %v1157_v19 = vsel %vm1153_vm2, %v3396_v4, -inf }
 0x2be   : > { %1158 = vmax.xlane.f32.xlu1 %v1157_v19 }
 0x2bf   : > { %v1154_v26 = vsel %vm1153_vm2, %v3399_v17, -inf }
 0x2c2   : > { %v2607_v20 = vpop.f32.mrf.mxu1  ;;  %1155 = vmax.xlane.f32.xlu1 %v1154_v26 }
 0x2c3   : > { %v3406_v42 = vadd.f32 %v2607_v20, %v3393_v52 }
 0x2c4   : > { %v1004_v44 = vpop.f32.mrf.mxu1 }
 0x2c5   : > { %v3409_v50 = vadd.f32 %v3393_v52, %v1004_v44  ;;  %v1163_v22 = vsel %vm1153_vm2, %v3406_v42, -inf }
 0x2c6   : > { %1164 = vmax.xlane.f32.xlu1 %v1163_v22 }
 0x2c7   : > { %v1160_v23 = vsel %vm1153_vm2, %v3409_v50, -inf }
 0x2ca   : > { %v2610_v53 = vpop.f32.mrf.mxu1  ;;  %1161 = vmax.xlane.f32.xlu1 %v1160_v23 }
 0x2cb   : > { %v3416_v25 = vadd.f32 %v2610_v53, %v3393_v52 }
 0x2cc   : > { %v1014_v61 = vpop.f32.mrf.mxu1 }
 0x2cd   : > { %v3419_v63 = vadd.f32 %v3393_v52, %v1014_v61  ;;  %v1169_v35 = vsel %vm1153_vm2, %v3416_v25, -inf }
 0x2ce   : > { %1170 = vmax.xlane.f32.xlu1 %v1169_v35 }
 0x2cf   : > { %v1166_v60 = vsel %vm1153_vm2, %v3419_v63, -inf }
 0x2d2   : > { %v2613_v30 = vpop.f32.mrf.mxu1  ;;  %1167 = vmax.xlane.f32.xlu1 %v1166_v60 }
 0x2d3   : > { %v3426_v32 = vadd.f32 %v2613_v30, %v3393_v52 }
 0x2d4   : > { %v1024_v34 = vpop.f32.mrf.mxu1 }
 0x2d5   : > { %v3429_v36 = vadd.f32 %v3393_v52, %v1024_v34  ;;  %v1175_v12 = vsel %vm1153_vm2, %v3426_v32, -inf }
 0x2d6   : > { %1176 = vmax.xlane.f32.xlu1 %v1175_v12 }
 0x2d7   : > { %v1172_v37 = vsel %vm1153_vm2, %v3429_v36, -inf }
 0x2da   : > { %v2616_v8 = vpop.f32.mrf.mxu1  ;;  %1173 = vmax.xlane.f32.xlu1 %v1172_v37 }
 0x2db   : > { %v3436_v0 = vadd.f32 %v2616_v8, %v3393_v52 }
 0x2dc   : > { %v1034_v6 = vpop.f32.mrf.mxu1 }
 0x2dd   : > { %v3439_v9 = vadd.f32 %v3393_v52, %v1034_v6  ;;  %v1181_v40 = vsel %vm1153_vm2, %v3436_v0, -inf }
 0x2de   : > { %1182 = vmax.xlane.f32.xlu1 %v1181_v40 }
 0x2df   : > { %v1178_v28 = vsel %vm1153_vm2, %v3439_v9, -inf }
 0x2e2   : > { %v2619_v54 = vpop.f32.mrf.mxu1  ;;  %1179 = vmax.xlane.f32.xlu1 %v1178_v28 }
 0x2e3   : > { %v3446_v14 = vadd.f32 %v2619_v54, %v3393_v52 }
 0x2e4   : > { %v1044_v18 = vpop.f32.mrf.mxu1 }
 0x2e5   : > { %v3449_v41 = vadd.f32 %v3393_v52, %v1044_v18  ;;  %v1187_v16 = vsel %vm1153_vm2, %v3446_v14, -inf }
 0x2e6   : > { %1188 = vmax.xlane.f32.xlu1 %v1187_v16 }
 0x2e7   : > { %v1184_v45 = vsel %vm1153_vm2, %v3449_v41, -inf }
 0x2ea   : > { %v2622_v46 = vpop.f32.mrf.mxu1  ;;  %1185 = vmax.xlane.f32.xlu1 %v1184_v45 }
 0x2eb   : > { %v3456_v3 = vadd.f32 %v2622_v46, %v3393_v52 }
 0x2ec   : > { %v1054_v47 = vpop.f32.mrf.mxu1 }
 0x2ed   : > { %v3459_v55 = vadd.f32 %v3393_v52, %v1054_v47  ;;  %v1193_v49 = vsel %vm1153_vm2, %v3456_v3, -inf }
 0x2ee   : > { %1194 = vmax.xlane.f32.xlu1 %v1193_v49 }
 0x2ef   : > { %v1190_v57 = vsel %vm1153_vm2, %v3459_v55, -inf }
 0x2f2   : > { %v2625_v24 = vpop.f32.mrf.mxu1  ;;  %1191 = vmax.xlane.f32.xlu1 %v1190_v57 }
 0x2f3   : > { %v3466_v21 = vadd.f32 %v2625_v24, %v3393_v52 }
 0x2f4   : > { %v1064_v58 = vpop.f32.mrf.mxu1 }
 0x2f5   : > { %v3469_v48 = vadd.f32 %v3393_v52, %v1064_v58  ;;  %v1199_v59 = vsel %vm1153_vm2, %v3466_v21, -inf }
 0x2f6   : > { %1200 = vmax.xlane.f32.xlu1 %v1199_v59 }
 0x2f7   : > { %v1196_v27 = vsel %vm1153_vm2, %v3469_v48, -inf }
 0x2f8   : > { %v2628_v29 = vpop.f32.mrf.mxu1 }
 0x2f9   : > { %v3474_v62 = vadd.f32 %v2628_v29, %v3393_v52 }
 0x2fa   : > { %1197 = vmax.xlane.f32.xlu1 %v1196_v27  ;;  %v1074_v1 = vpop.f32.mrf.mxu1 }
 0x2fb   : > { %v3479_v39 = vadd.f32 %v3393_v52, %v1074_v1  ;;  %v1205_v5 = vsel %vm1153_vm2, %v3474_v62, -inf }
 0x2fd   : > { %v1202_v7 = vsel %vm1153_vm2, %v3479_v39, -inf }
 0x2fe   : > { %1206 = vmax.xlane.f32.xlu1 %v1205_v5 }
 0x302   : > { %v2631_v10 = vpop.f32.mrf.mxu1  ;;  %1203 = vmax.xlane.f32.xlu1 %v1202_v7 }
 0x303   : > { %v3486_v43 = vadd.f32 %v2631_v10, %v3393_v52 }
 0x304   : > { %v1084_v33 = vpop.f32.mrf.mxu1 }
 0x305   : > { %v3489_v38 = vadd.f32 %v3393_v52, %v1084_v33  ;;  %v1211_v31 = vsel %vm1153_vm2, %v3486_v43, -inf }
 0x306   : > { %1212 = vmax.xlane.f32.xlu1 %v1211_v31 }
 0x307   : > { %v1208_v11 = vsel %vm1153_vm2, %v3489_v38, -inf }
 0x30a   : > { %v2634_v13 = vpop.f32.mrf.mxu1  ;;  %1209 = vmax.xlane.f32.xlu1 %v1208_v11 }
 0x30b   : > { %v3496_v56 = vadd.f32 %v2634_v13, %v3393_v52 }
 0x30c   : > { %v1094_v51 = vpop.f32.mrf.mxu1 }
 0x30d   : > { %v3499_v2 = vadd.f32 %v3393_v52, %v1094_v51  ;;  %v1217_v15 = vsel %vm1153_vm2, %v3496_v56, -inf }
 0x30e   : > { %1218 = vmax.xlane.f32.xlu1 %v1217_v15 }
 0x30f   : > { %v1214_v19 = vsel %vm1153_vm2, %v3499_v2, -inf }
 0x312   : > { %v2637_v26 = vpop.f32.mrf.mxu1  ;;  %1215 = vmax.xlane.f32.xlu1 %v1214_v19 }
 0x313   : > { %v3506_v20 = vadd.f32 %v2637_v26, %v3393_v52 }
 0x314   : > { %v1104_v44 = vpop.f32.mrf.mxu1 }
 0x315   : > { %v3509_v22 = vadd.f32 %v3393_v52, %v1104_v44  ;;  %v1223_v23 = vsel %vm1153_vm2, %v3506_v20, -inf }
 0x316   : > { %1224 = vmax.xlane.f32.xlu0 %v1223_v23 }
 0x317   : > { %v1220_v53 = vsel %vm1153_vm2, %v3509_v22, -inf }
 0x31a   : > { %v2640_v61 = vpop.f32.mrf.mxu1  ;;  %1221 = vmax.xlane.f32.xlu0 %v1220_v53 }
 0x31b   : > { %v3516_v35 = vadd.f32 %v2640_v61, %v3393_v52 }
 0x31c   : > { %v1114_v60 = vpop.f32.mrf.mxu1 }
 0x31d   : > { %v3519_v30 = vadd.f32 %v3393_v52, %v1114_v60  ;;  %v1229_v34 = vsel %vm1153_vm2, %v3516_v35, -inf }
 0x31e   : > { %1230 = vmax.xlane.f32.xlu0 %v1229_v34 }
 0x31f   : > { %v1226_v12 = vsel %vm1153_vm2, %v3519_v30, -inf }
 0x322   : > { %v2643_v37 = vpop.f32.mrf.mxu1  ;;  %1227 = vmax.xlane.f32.xlu0 %v1226_v12 }
 0x323   : > { %v3526_v8 = vadd.f32 %v2643_v37, %v3393_v52 }
 0x324   : > { %v1124_v6 = vpop.f32.mrf.mxu1 }
 0x325   : > { %v3529_v40 = vadd.f32 %v3393_v52, %v1124_v6  ;;  %v1235_v28 = vsel %vm1153_vm2, %v3526_v8, -inf }
 0x326   : > { %1236 = vmax.xlane.f32.xlu0 %v1235_v28 }
 0x327   : > { %v1232_v54 = vsel %vm1153_vm2, %v3529_v40, -inf }
 0x32a   : > { %v2646_v18 = vpop.f32.mrf.mxu1  ;;  %1233 = vmax.xlane.f32.xlu0 %v1232_v54 }
 0x32b   : > { %v3536_v16 = vadd.f32 %v2646_v18, %v3393_v52 }
 0x32c   : > { %v1134_v45 = vpop.f32.mrf.mxu1 }
 0x32d   : > { %v3539_v46 = vadd.f32 %v3393_v52, %v1134_v45  ;;  %v1241_v47 = vsel %vm1153_vm2, %v3536_v16, -inf }
 0x32e   : > { %1242 = vmax.xlane.f32.xlu0 %v1241_v47 }
 0x32f   : > { %v1238_v49 = vsel %vm1153_vm2, %v3539_v46, -inf }
 0x332   : > { %1239 = vmax.xlane.f32.xlu0 %v1238_v49 }
 0x333   : > { %v2649_v57 = vpop.f32.mrf.mxu1 }
 0x334   : > { %v3546_v24 = vadd.f32 %v2649_v57, %v3393_v52 }
 0x335   : > { %v1144_v58 = vpop.f32.mrf.mxu1 }
 0x336   : > { %v3549_v59 = vadd.f32 %v3393_v52, %v1144_v58  ;;  %v1247_v29 = vsel %vm1153_vm2, %v3546_v24, -inf }
 0x337   : > { %1248 = vmax.xlane.f32.xlu0 %v1247_v29 }
 0x338   : > { %v1244_v27 = vsel %vm1153_vm2, %v3549_v59, -inf }
 0x33b   : > { %1245 = vmax.xlane.f32.xlu0 %v1244_v27 }
 0x347   : > { %v1159_v1 = vpop.xlane.xlu1 %1158 }
 0x348   : > { %v1251_v5 = vsub.f32 %v3396_v4, %v1159_v1 }
 0x34a   : > { %v1284_v7 = vmul.f32 1.442695, %v1251_v5 }
 0x34b   : > { %v1156_v10 = vpop.xlane.xlu1 %1155 }
 0x34c   : > { %2783 = vpow2.f32 %v1284_v7  ;;  %v1250_v33 = vsub.f32 %v3399_v17, %v1156_v10 }
 0x34e   : > { %v1282_v31 = vmul.f32 1.442695, %v1250_v33 }
 0x34f   : > { %v1165_v11 = vpop.xlane.xlu1 %1164 }
 0x350   : > { %2785 = vpow2.f32 %v1282_v31  ;;  %v1253_v52 = vsub.f32 %v3406_v42, %v1165_v11 }
 0x352   : > { %v1288_v13 = vmul.f32 1.442695, %v1253_v52 }
 0x353   : > { %v1162_v51 = vpop.xlane.xlu1 %1161 }
 0x354   : > { %2787 = vpow2.f32 %v1288_v13  ;;  %v1252_v15 = vsub.f32 %v3409_v50, %v1162_v51 }
 0x356   : > { %v1286_v19 = vmul.f32 1.442695, %v1252_v15 }
 0x357   : > { %v1171_v26 = vpop.xlane.xlu1 %1170 }
 0x358   : > { %2789 = vpow2.f32 %v1286_v19  ;;  %v1255_v4 = vsub.f32 %v3416_v25, %v1171_v26 }
 0x359   : > { %v3560_v44 = vpop.eup %2783 }
 0x35a   : > { %v1292_v23 = vmul.f32 1.442695, %v1255_v4  ;;  %v1349_v17 = vsel %vm1153_vm2, %v3560_v44, 0.0 }
 0x35b   : > { %v1168_v53 = vpop.xlane.xlu1 %1167  ;;  %1350 = vadd.xlane.f32.xlu1 %v1349_v17 }
 0x35c   : > { %2791 = vpow2.f32 %v1292_v23  ;;  %v1254_v42 = vsub.f32 %v3419_v63, %v1168_v53 }
 0x35d   : > { %v3565_v61 = vpop.eup %2785 }
 0x35e   : > { %v1290_v60 = vmul.f32 1.442695, %v1254_v42  ;;  %v1346_v50 = vsel %vm1153_vm2, %v3565_v61, 0.0 }
 0x35f   : > { %v1177_v34 = vpop.xlane.xlu1 %1176  ;;  %1347 = vadd.xlane.f32.xlu1 %v1346_v50 }
 0x360   : > { %2793 = vpow2.f32 %v1290_v60  ;;  %v1257_v25 = vsub.f32 %v3426_v32, %v1177_v34 }
 0x361   : > { %v3570_v12 = vpop.eup %2787 }
 0x362   : > { %v1296_v37 = vmul.f32 1.442695, %v1257_v25  ;;  %v1355_v6 = vsel %vm1153_vm2, %v3570_v12, 0.0 }
 0x363   : > { %v1174_v28 = vpop.xlane.xlu1 %1173  ;;  %1356 = vadd.xlane.f32.xlu1 %v1355_v6 }
 0x364   : > { %2795 = vpow2.f32 %v1296_v37  ;;  %v1256_v63 = vsub.f32 %v3429_v36, %v1174_v28 }
 0x365   : > { %v3575_v54 = vpop.eup %2789 }
 0x366   : > { %v1294_v18 = vmul.f32 1.442695, %v1256_v63  ;;  %v1352_v45 = vsel %vm1153_vm2, %v3575_v54, 0.0 }
 0x367   : > { %v1183_v47 = vpop.xlane.xlu1 %1182  ;;  %1353 = vadd.xlane.f32.xlu1 %v1352_v45 }
 0x368   : > { %2797 = vpow2.f32 %v1294_v18  ;;  %v1259_v32 = vsub.f32 %v3436_v0, %v1183_v47 }
 0x369   : > { %v3580_v49 = vpop.eup %2791 }
 0x36a   : > { %v1300_v57 = vmul.f32 1.442695, %v1259_v32  ;;  %v1361_v58 = vsel %vm1153_vm2, %v3580_v49, 0.0 }
 0x36b   : > { %v1180_v29 = vpop.xlane.xlu1 %1179  ;;  %1362 = vadd.xlane.f32.xlu1 %v1361_v58 }
 0x36c   : > { %2799 = vpow2.f32 %v1300_v57  ;;  %v1258_v36 = vsub.f32 %v3439_v9, %v1180_v29 }
 0x36d   : > { %v3585_v27 = vpop.eup %2793 }
 0x36e   : > { %v1298_v1 = vmul.f32 1.442695, %v1258_v36  ;;  %v1358_v5 = vsel %vm1153_vm2, %v3585_v27, 0.0 }
 0x36f   : > { %v1189_v7 = vpop.xlane.xlu1 %1188  ;;  %1359 = vadd.xlane.f32.xlu1 %v1358_v5 }
 0x370   : > { %2801 = vpow2.f32 %v1298_v1  ;;  %v1261_v0 = vsub.f32 %v3446_v14, %v1189_v7 }
 0x371   : > { %v3590_v10 = vpop.eup %2795 }
 0x372   : > { %v1304_v33 = vmul.f32 1.442695, %v1261_v0  ;;  %v1367_v31 = vsel %vm1153_vm2, %v3590_v10, 0.0 }
 0x373   : > { %v1186_v11 = vpop.xlane.xlu1 %1185  ;;  %1368 = vadd.xlane.f32.xlu1 %v1367_v31 }
 0x374   : > { %2803 = vpow2.f32 %v1304_v33  ;;  %v1260_v9 = vsub.f32 %v3449_v41, %v1186_v11 }
 0x375   : > { %v3595_v52 = vpop.eup %2797 }
 0x376   : > { %v1302_v13 = vmul.f32 1.442695, %v1260_v9  ;;  %v1364_v51 = vsel %vm1153_vm2, %v3595_v52, 0.0 }
 0x377   : > { %v1195_v15 = vpop.xlane.xlu1 %1194  ;;  %1365 = vadd.xlane.f32.xlu1 %v1364_v51 }
 0x378   : > { %2805 = vpow2.f32 %v1302_v13  ;;  %v1263_v14 = vsub.f32 %v3456_v3, %v1195_v15 }
 0x379   : > { %v3600_v19 = vpop.eup %2799 }
 0x37a   : > { %v1308_v26 = vmul.f32 1.442695, %v1263_v14  ;;  %v1373_v4 = vsel %vm1153_vm2, %v3600_v19, 0.0 }
 0x37b   : > { %v1192_v23 = vpop.xlane.xlu1 %1191  ;;  %1374 = vadd.xlane.f32.xlu1 %v1373_v4 }
 0x37c   : > { %2807 = vpow2.f32 %v1308_v26  ;;  %v1262_v41 = vsub.f32 %v3459_v55, %v1192_v23 }
 0x37d   : > { %v3605_v17 = vpop.eup %2801 }
 0x37e   : > { %v1306_v53 = vmul.f32 1.442695, %v1262_v41  ;;  %v1370_v42 = vsel %vm1153_vm2, %v3605_v17, 0.0 }
 0x37f   : > { %v1201_v60 = vpop.xlane.xlu1 %1200  ;;  %1371 = vadd.xlane.f32.xlu1 %v1370_v42 }
 0x380   : > { %2809 = vpow2.f32 %v1306_v53  ;;  %v1265_v3 = vsub.f32 %v3466_v21, %v1201_v60 }
 0x381   : > { %v3610_v50 = vpop.eup %2803 }
 0x382   : > { %v1312_v34 = vmul.f32 1.442695, %v1265_v3  ;;  %v1379_v25 = vsel %vm1153_vm2, %v3610_v50, 0.0 }
 0x383   : > { %v1198_v37 = vpop.xlane.xlu1 %1197  ;;  %1380 = vadd.xlane.f32.xlu1 %v1379_v25 }
 0x384   : > { %2811 = vpow2.f32 %v1312_v34  ;;  %v1264_v55 = vsub.f32 %v3469_v48, %v1198_v37 }
 0x385   : > { %v3615_v6 = vpop.eup %2805 }
 0x386   : > { %v1310_v28 = vmul.f32 1.442695, %v1264_v55  ;;  %v1376_v63 = vsel %vm1153_vm2, %v3615_v6, 0.0 }
 0x387   : > { %v1207_v18 = vpop.xlane.xlu1 %1206  ;;  %1377 = vadd.xlane.f32.xlu1 %v1376_v63 }
 0x388   : > { %2813 = vpow2.f32 %v1310_v28  ;;  %v1267_v21 = vsub.f32 %v3474_v62, %v1207_v18 }
 0x389   : > { %v3620_v45 = vpop.eup %2807 }
 0x38a   : > { %v1316_v47 = vmul.f32 1.442695, %v1267_v21  ;;  %v1385_v32 = vsel %vm1153_vm2, %v3620_v45, 0.0 }
 0x38b   : > { %1386 = vadd.xlane.f32.xlu1 %v1385_v32  ;;  %v1204_v57 = vpop.xlane.xlu1 %1203 }
 0x38c   : > { %2815 = vpow2.f32 %v1316_v47  ;;  %v1266_v48 = vsub.f32 %v3479_v39, %v1204_v57 }
 0x38d   : > { %v3625_v58 = vpop.eup %2809 }
 0x38e   : > { %v1314_v29 = vmul.f32 1.442695, %v1266_v48  ;;  %v1382_v36 = vsel %vm1153_vm2, %v3625_v58, 0.0 }
 0x38f   : > { %1383 = vadd.xlane.f32.xlu1 %v1382_v36  ;;  %v1213_v1 = vpop.xlane.xlu1 %1212 }
 0x390   : > { %2817 = vpow2.f32 %v1314_v29  ;;  %v1269_v62 = vsub.f32 %v3486_v43, %v1213_v1 }
 0x391   : > { %v3630_v5 = vpop.eup %2811 }
 0x392   : > { %v1320_v7 = vmul.f32 1.442695, %v1269_v62  ;;  %v1391_v0 = vsel %vm1153_vm2, %v3630_v5, 0.0 }
 0x393   : > { %1392 = vadd.xlane.f32.xlu1 %v1391_v0  ;;  %v1210_v33 = vpop.xlane.xlu1 %1209 }
 0x394   : > { %2819 = vpow2.f32 %v1320_v7  ;;  %v1268_v39 = vsub.f32 %v3489_v38, %v1210_v33 }
 0x395   : > { %v3635_v31 = vpop.eup %2813 }
 0x396   : > { %v1318_v11 = vmul.f32 1.442695, %v1268_v39  ;;  %v1388_v9 = vsel %vm1153_vm2, %v3635_v31, 0.0 }
 0x397   : > { %1389 = vadd.xlane.f32.xlu1 %v1388_v9  ;;  %v1219_v13 = vpop.xlane.xlu1 %1218 }
 0x398   : > { %2821 = vpow2.f32 %v1318_v11  ;;  %v1271_v43 = vsub.f32 %v3496_v56, %v1219_v13 }
 0x399   : > { %v3640_v51 = vpop.eup %2815 }
 0x39a   : > { %v1324_v15 = vmul.f32 1.442695, %v1271_v43  ;;  %v1397_v14 = vsel %vm1153_vm2, %v3640_v51, 0.0 }
 0x39b   : > { %1398 = vadd.xlane.f32.xlu0 %v1397_v14  ;;  %v1216_v26 = vpop.xlane.xlu1 %1215 }
 0x39c   : > { %2823 = vpow2.f32 %v1324_v15  ;;  %v1270_v38 = vsub.f32 %v3499_v2, %v1216_v26 }
 0x39d   : > { %v3645_v4 = vpop.eup %2817 }
 0x39e   : > { %v1322_v23 = vmul.f32 1.442695, %v1270_v38  ;;  %v1394_v41 = vsel %vm1153_vm2, %v3645_v4, 0.0 }
 0x39f   : > { %v1225_v53 = vpop.xlane.xlu0 %1224  ;;  %1395 = vadd.xlane.f32.xlu0 %v1394_v41 }
 0x3a0   : > { %2825 = vpow2.f32 %v1322_v23  ;;  %v1273_v56 = vsub.f32 %v3506_v20, %v1225_v53 }
 0x3a1   : > { %v3650_v42 = vpop.eup %2819 }
 0x3a2   : > { %v1328_v60 = vmul.f32 1.442695, %v1273_v56  ;;  %v1403_v3 = vsel %vm1153_vm2, %v3650_v42, 0.0 }
 0x3a3   : > { %v1222_v34 = vpop.xlane.xlu0 %1221  ;;  %1404 = vadd.xlane.f32.xlu0 %v1403_v3 }
 0x3a4   : > { %2827 = vpow2.f32 %v1328_v60  ;;  %v1272_v2 = vsub.f32 %v3509_v22, %v1222_v34 }
 0x3a5   : > { %v3655_v25 = vpop.eup %2821 }
 0x3a6   : > { %v1326_v37 = vmul.f32 1.442695, %v1272_v2  ;;  %v1400_v55 = vsel %vm1153_vm2, %v3655_v25, 0.0 }
 0x3a7   : > { %v1231_v28 = vpop.xlane.xlu0 %1230  ;;  %1401 = vadd.xlane.f32.xlu0 %v1400_v55 }
 0x3a8   : > { %2829 = vpow2.f32 %v1326_v37  ;;  %v1275_v20 = vsub.f32 %v3516_v35, %v1231_v28 }
 0x3a9   : > { %v3660_v63 = vpop.eup %2823 }
 0x3aa   : > { %v1332_v18 = vmul.f32 1.442695, %v1275_v20  ;;  %v1409_v21 = vsel %vm1153_vm2, %v3660_v63, 0.0 }
 0x3ab   : > { %v1228_v47 = vpop.xlane.xlu0 %1227  ;;  %1410 = vadd.xlane.f32.xlu0 %v1409_v21 }
 0x3ac   : > { %2831 = vpow2.f32 %v1332_v18  ;;  %v1274_v22 = vsub.f32 %v3519_v30, %v1228_v47 }
 0x3ad   : > { %v3665_v32 = vpop.eup %2825 }
 0x3ae   : > { %v1330_v57 = vmul.f32 1.442695, %v1274_v22  ;;  %v1406_v48 = vsel %vm1153_vm2, %v3665_v32, 0.0 }
 0x3af   : > { %v1237_v29 = vpop.xlane.xlu0 %1236  ;;  %1407 = vadd.xlane.f32.xlu0 %v1406_v48 }
 0x3b0   : > { %2833 = vpow2.f32 %v1330_v57  ;;  %v1277_v35 = vsub.f32 %v3526_v8, %v1237_v29 }
 0x3b1   : > { %v3670_v36 = vpop.eup %2827 }
 0x3b2   : > { %v1336_v1 = vmul.f32 1.442695, %v1277_v35  ;;  %v1415_v62 = vsel %vm1153_vm2, %v3670_v36, 0.0 }
 0x3b3   : > { %v1234_v7 = vpop.xlane.xlu0 %1233  ;;  %1416 = vadd.xlane.f32.xlu0 %v1415_v62 }
 0x3b4   : > { %2835 = vpow2.f32 %v1336_v1  ;;  %v1276_v30 = vsub.f32 %v3529_v40, %v1234_v7 }
 0x3b5   : > { %v3675_v0 = vpop.eup %2829 }
 0x3b6   : > { %v1334_v33 = vmul.f32 1.442695, %v1276_v30  ;;  %v1412_v39 = vsel %vm1153_vm2, %v3675_v0, 0.0 }
 0x3b7   : > { %v1243_v11 = vpop.xlane.xlu0 %1242  ;;  %1413 = vadd.xlane.f32.xlu0 %v1412_v39 }
 0x3b8   : > { %2837 = vpow2.f32 %v1334_v33  ;;  %v1279_v8 = vsub.f32 %v3536_v16, %v1243_v11 }
 0x3b9   : > { %v3680_v9 = vpop.eup %2831 }
 0x3ba   : > { %v1340_v13 = vmul.f32 1.442695, %v1279_v8  ;;  %v1421_v43 = vsel %vm1153_vm2, %v3680_v9, 0.0 }
 0x3bb   : > { %v1240_v15 = vpop.xlane.xlu0 %1239  ;;  %1422 = vadd.xlane.f32.xlu0 %v1421_v43 }
 0x3bc   : > { %2839 = vpow2.f32 %v1340_v13  ;;  %v1278_v40 = vsub.f32 %v3539_v46, %v1240_v15 }
 0x3bd   : > { %v3685_v14 = vpop.eup %2833 }
 0x3be   : > { %v1338_v26 = vmul.f32 1.442695, %v1278_v40  ;;  %v1418_v38 = vsel %vm1153_vm2, %v3685_v14, 0.0 }
 0x3bf   : > { %1419 = vadd.xlane.f32.xlu0 %v1418_v38 }
 0x3c0   : > { %2841 = vpow2.f32 %v1338_v26  ;;  %v1249_v16 = vpop.xlane.xlu0 %1248 }
 0x3c1   : > { %v3689_v23 = vpop.eup %2835  ;;  %v1281_v41 = vsub.f32 %v3546_v24, %v1249_v16 }
 0x3c2   : > { %v1427_v53 = vsel %vm1153_vm2, %v3689_v23, 0.0 }
 0x3c3   : > { %v1344_v56 = vmul.f32 1.442695, %v1281_v41  ;;  %1428 = vadd.xlane.f32.xlu0 %v1427_v53 }
 0x3c4   : > { %v1246_v60 = vpop.xlane.xlu0 %1245 }
 0x3c5   : > { %v3694_v46 = vpop.eup %2837  ;;  %2843 = vpow2.f32 %v1344_v56  ;;  %v1280_v3 = vsub.f32 %v3549_v59, %v1246_v60 }
 0x3c6   : > { %v1424_v34 = vsel %vm1153_vm2, %v3694_v46, 0.0 }
 0x3c7   : > { %v1342_v2 = vmul.f32 1.442695, %v1280_v3  ;;  %1425 = vadd.xlane.f32.xlu0 %v1424_v34 }
 0x3c9   : > { %v3699_v37 = vpop.eup %2839  ;;  %2845 = vpow2.f32 %v1342_v2 }
 0x3ca   : > { %v1433_v24 = vsel %vm1153_vm2, %v3699_v37, 0.0 }
 0x3cb   : > { %1434 = vadd.xlane.f32.xlu0 %v1433_v24 }
 0x3cd   : > { %v3703_v55 = vpop.eup %2841 }
 0x3ce   : > { %v1430_v28 = vsel %vm1153_vm2, %v3703_v55, 0.0 }
 0x3cf   : > { %1431 = vadd.xlane.f32.xlu0 %v1430_v28 }
 0x3d2   : > { %v3707_v20 = vpop.eup %2843 }
 0x3d3   : > { %v1439_v59 = vsel %vm1153_vm2, %v3707_v20, 0.0 }
 0x3d4   : > { %1440 = vadd.xlane.f32.xlu0 %v1439_v59 }
 0x3d6   : > { %v3711_v18 = vpop.eup %2845 }
 0x3d7   : > { %v1436_v21 = vsel %vm1153_vm2, %v3711_v18, 0.0 }
 0x3d8   : > { %1437 = vadd.xlane.f32.xlu0 %v1436_v21 }
 0x3e4   : > { %v1351_v47 = vpop.xlane.xlu1 %1350 }
 0x3e5   : > { %2847 = vrcp.f32 %v1351_v47 }
 0x3e8   : > { %v1348_v22 = vpop.xlane.xlu1 %1347 }
 0x3e9   : > { %2849 = vrcp.f32 %v1348_v22 }
 0x3ec   : > { %v1357_v57 = vpop.xlane.xlu1 %1356 }
 0x3ed   : > { %2851 = vrcp.f32 %v1357_v57 }
 0x3f0   : > { %v1354_v48 = vpop.xlane.xlu1 %1353 }
 0x3f1   : > { %2853 = vrcp.f32 %v1354_v48 }
 0x3f2   : > { %v2848_v29 = vpop.eup %2847 }
 0x3f3   : > { %v3716_v35 = vmul.f32 %v2848_v29, %v3560_v44 }
 0x3f4   : > { %v1363_v1 = vpop.xlane.xlu1 %1362 }
 0x3f5   : > { %1540 = vrot.lane.b32.xlu1 %v3716_v35, %s2956_s26  ;;  %2855 = vrcp.f32 %v1363_v1 }
 0x3f6   : > { %v2850_v7 = vpop.eup %2849 }
 0x3f7   : > { %v3725_v44 = vmul.f32 %v2850_v7, %v3565_v61 }
 0x3f8   : > { %v1360_v62 = vpop.xlane.xlu1 %1359 }
 0x3f9   : > { %1636 = vrot.lane.b32.xlu1 %v3716_v35, %s2957_s27 }
 0x3fa   : > { %v2852_v11 = vpop.eup %2851 }
 0x3fb   : > { %v3736_v13 = vmul.f32 %v2852_v11, %v3570_v12 }
 0x3fc   : > { %v1369_v30 = vpop.xlane.xlu1 %1368 }
 0x3fd   : > { %1732 = vrot.lane.b32.xlu1 %v3716_v35, %s2958_s28 }
 0x3fe   : > { %v2854_v15 = vpop.eup %2853 }
 0x3ff   : > { %v3751_v12 = vmul.f32 %v2854_v15, %v3575_v54 }
 0x400   : > { %v1366_v33 = vpop.xlane.xlu1 %1365 }
 0x401   : > { %1538 = vrot.lane.b32.xlu1 %v3725_v44, %s2956_s26 }
 0x402   : > { %v2856_v16 = vpop.eup %2855 }
 0x403   : > { %v3762_v41 = vmul.f32 %v2856_v16, %v3580_v49 }
 0x404   : > { %v1375_v39 = vpop.xlane.xlu1 %1374 }
 0x405   : > { %1634 = vrot.lane.b32.xlu1 %v3725_v44, %s2957_s27 }
 0x408   : > { %v3731_v8 = vpop.xlane.xlu1 %1371 }
 0x409   : > { %1730 = vrot.lane.b32.xlu1 %v3725_v44, %s2958_s28 }
 0x40c   : > { %v3738_v61 = vpop.xlane.xlu1 %1380 }
 0x40d   : > { %1544 = vrot.lane.b32.xlu1 %v3736_v13, %s2956_s26 }
 0x410   : > { %v3742_v43 = vpop.xlane.xlu1 %1377 }
 0x411   : > { %1640 = vrot.lane.b32.xlu1 %v3736_v13, %s2957_s27 }
 0x414   : > { %v3746_v40 = vpop.xlane.xlu1 %1386 }
 0x415   : > { %1736 = vrot.lane.b32.xlu1 %v3736_v13, %s2958_s28 }
 0x418   : > { %v3753_v26 = vpop.xlane.xlu1 %1383 }
 0x419   : > { %1542 = vrot.lane.b32.xlu1 %v3751_v12, %s2956_s26 }
 0x41c   : > { %v1393_v38 = vpop.xlane.xlu1 %1392 }
 0x41d   : > { %2857 = vrcp.f32 %v1393_v38  ;;  %1638 = vrot.lane.b32.xlu1 %v3751_v12, %s2957_s27 }
 0x41e   : > { %2859 = vrcp.f32 %v1360_v62 }
 0x420   : > { %v3857_v7 = vpop.xlane.xlu1 %1389 }
 0x421   : > { %1734 = vrot.lane.b32.xlu1 %v3751_v12, %s2958_s28 }
 0x424   : > { %v1399_v54 = vpop.xlane.xlu0 %1398 }
 0x425   : > { %2861 = vrcp.f32 %v1399_v54  ;;  %1548 = vrot.lane.b32.xlu1 %v3762_v41, %s2956_s26 }
 0x426   : > { %2863 = vrcp.f32 %v1369_v30 }
 0x428   : > { %v1396_v3 = vpop.xlane.xlu0 %1395 }
 0x429   : > { %1644 = vrot.lane.b32.xlu1 %v3762_v41, %s2957_s27  ;;  %2865 = vrcp.f32 %v1396_v3 }
 0x42a   : > { %v2858_v53 = vpop.eup %2857  ;;  %2867 = vrcp.f32 %v1366_v33 }
 0x42b   : > { %v3769_v56 = vmul.f32 %v2858_v53, %v3630_v5  ;;  %v2860_v60 = vpop.eup %2859 }
 0x42c   : > { %v3776_v49 = vmul.f32 %v2860_v60, %v3585_v27  ;;  %v1405_v5 = vpop.xlane.xlu0 %1404 }
 0x42d   : > { %1740 = vrot.lane.b32.xlu1 %v3762_v41, %s2958_s28  ;;  %1664 = vrot.lane.b32.xlu0 %v3769_v56, %s2957_s27  ;;  %2869 = vrcp.f32 %v1405_v5 }
 0x42e   : > { %2871 = vrcp.f32 %v1375_v39 }
 0x430   : > { %v1402_v59 = vpop.xlane.xlu0 %1401 }
 0x431   : > { %1546 = vrot.lane.b32.xlu1 %v3776_v49, %s2956_s26  ;;  %2873 = vrcp.f32 %v1402_v59 }
 0x432   : > { %v2862_v34 = vpop.eup %2861  ;;  %2875 = vrcp.f32 %v3731_v8 }
 0x433   : > { %v3781_v2 = vmul.f32 %v2862_v34, %v3640_v51  ;;  %v2864_v24 = vpop.eup %2863 }
 0x434   : > { %v3792_v27 = vmul.f32 %v2864_v24, %v3590_v10  ;;  %v1411_v22 = vpop.xlane.xlu0 %1410 }
 0x435   : > { %1642 = vrot.lane.b32.xlu1 %v3776_v49, %s2957_s27  ;;  %1572 = vrot.lane.b32.xlu0 %v3781_v2, %s2956_s26  ;;  %2877 = vrcp.f32 %v1411_v22 }
 0x436   : > { %v2866_v51 = vpop.eup %2865  ;;  %2879 = vrcp.f32 %v3738_v61 }
 0x437   : > { %v3799_v28 = vmul.f32 %v2866_v51, %v3645_v4  ;;  %v2868_v10 = vpop.eup %2867 }
 0x438   : > { %v3810_v4 = vmul.f32 %v2868_v10, %v3595_v52  ;;  %v1408_v29 = vpop.xlane.xlu0 %1407 }
 0x439   : > { %1738 = vrot.lane.b32.xlu1 %v3776_v49, %s2958_s28  ;;  %1668 = vrot.lane.b32.xlu0 %v3781_v2, %s2957_s27  ;;  %2881 = vrcp.f32 %v1408_v29 }
 0x43a   : > { %v2870_v21 = vpop.eup %2869  ;;  %2883 = vrcp.f32 %v3742_v43 }
 0x43b   : > { %v3813_v47 = vmul.f32 %v2870_v21, %v3650_v42  ;;  %v2872_v52 = vpop.eup %2871 }
 0x43c   : > { %v3829_v42 = vmul.f32 %v2872_v52, %v3600_v19  ;;  %v1417_v30 = vpop.xlane.xlu0 %1416 }
 0x43d   : > { %1552 = vrot.lane.b32.xlu1 %v3792_v27, %s2956_s26  ;;  %1764 = vrot.lane.b32.xlu0 %v3781_v2, %s2958_s28  ;;  %2885 = vrcp.f32 %v1417_v30 }
 0x43e   : > { %v2874_v57 = vpop.eup %2873  ;;  %2887 = vrcp.f32 %v3746_v40 }
 0x43f   : > { %v3832_v48 = vmul.f32 %v2874_v57, %v3655_v25  ;;  %v2876_v19 = vpop.eup %2875 }
 0x440   : > { %v3848_v25 = vmul.f32 %v2876_v19, %v3605_v17  ;;  %v1414_v15 = vpop.xlane.xlu0 %1413 }
 0x441   : > { %1648 = vrot.lane.b32.xlu1 %v3792_v27, %s2957_s27  ;;  %1570 = vrot.lane.b32.xlu0 %v3799_v28, %s2956_s26  ;;  %2889 = vrcp.f32 %v1414_v15 }
 0x442   : > { %v2878_v1 = vpop.eup %2877  ;;  %2891 = vrcp.f32 %v3753_v26 }
 0x443   : > { %v3851_v62 = vmul.f32 %v2878_v1, %v3660_v63  ;;  %v2880_v17 = vpop.eup %2879 }
 0x444   : > { %v3871_v8 = vmul.f32 %v2880_v17, %v3610_v50  ;;  %v1423_v16 = vpop.xlane.xlu0 %1422 }
 0x445   : > { %1744 = vrot.lane.b32.xlu1 %v3792_v27, %s2958_s28  ;;  %1762 = vrot.lane.b32.xlu0 %v3799_v28, %s2958_s28  ;;  %2893 = vrcp.f32 %v1423_v16 }
 0x446   : > { %v2882_v33 = vpop.eup %2881 }
 0x447   : > { %v3874_v61 = vmul.f32 %v2882_v33, %v3665_v32  ;;  %v2884_v50 = vpop.eup %2883 }
 0x448   : > { %v3897_v60 = vmul.f32 %v2884_v50, %v3615_v6  ;;  %v1420_v34 = vpop.xlane.xlu0 %1419 }
 0x449   : > { %1550 = vrot.lane.b32.xlu1 %v3810_v4, %s2956_s26  ;;  %1576 = vrot.lane.b32.xlu0 %v3813_v47, %s2956_s26  ;;  %2895 = vrcp.f32 %v1420_v34 }
 0x44a   : > { %2897 = vrcp.f32 %v3857_v7 }
 0x44c   : > { %v1429_v51 = vpop.xlane.xlu0 %1428 }
 0x44d   : > { %1646 = vrot.lane.b32.xlu1 %v3810_v4, %s2957_s27  ;;  %1672 = vrot.lane.b32.xlu0 %v3813_v47, %s2957_s27  ;;  %2899 = vrcp.f32 %v1429_v51 }
 0x450   : > { %v1426_v52 = vpop.xlane.xlu0 %1425 }
 0x451   : > { %1742 = vrot.lane.b32.xlu1 %v3810_v4, %s2958_s28  ;;  %1768 = vrot.lane.b32.xlu0 %v3813_v47, %s2958_s28 }
 0x454   : > { %v1435_v19 = vpop.xlane.xlu0 %1434 }
 0x455   : > { %1556 = vrot.lane.b32.xlu1 %v3829_v42, %s2956_s26  ;;  %1574 = vrot.lane.b32.xlu0 %v3832_v48, %s2956_s26 }
 0x459   : > { %1652 = vrot.lane.b32.xlu1 %v3829_v42, %s2957_s27  ;;  %1670 = vrot.lane.b32.xlu0 %v3832_v48, %s2957_s27 }
 0x45d   : > { %1748 = vrot.lane.b32.xlu1 %v3829_v42, %s2958_s28  ;;  %1766 = vrot.lane.b32.xlu0 %v3832_v48, %s2958_s28 }
 0x461   : > { %1554 = vrot.lane.b32.xlu1 %v3848_v25, %s2956_s26  ;;  %1580 = vrot.lane.b32.xlu0 %v3851_v62, %s2956_s26 }
 0x465   : > { %1650 = vrot.lane.b32.xlu1 %v3848_v25, %s2957_s27  ;;  %1676 = vrot.lane.b32.xlu0 %v3851_v62, %s2957_s27 }
 0x467   : > { %v1541_v63 = vpop.permute.xlu1 %1540 }
 0x468   : > { %v1827_v39 = vsel %vm1153_vm2, %v3716_v35, %v1541_v63  ;;  %v2886_v35 = vpop.eup %2885 }
 0x469   : > { %1746 = vrot.lane.b32.xlu1 %v3848_v25, %s2958_s28  ;;  %1772 = vrot.lane.b32.xlu0 %v3851_v62, %s2958_s28  ;;  %v3900_v40 = vmul.f32 %v2886_v35, %v3670_v36  ;;  %v2888_v6 = vpop.eup %2887 }
 0x46a   : > { %v2890_v24 = vpop.eup %2889  ;;  %v3922_v21 = vmul.f32 %v2888_v6, %v3620_v45 }
 0x46b   : > { %v1637_v11 = vpop.permute.xlu1 %1636  ;;  %v3925_v26 = vmul.f32 %v2890_v24, %v3675_v0  ;;  %v2892_v45 = vpop.eup %2891 }
 0x46c   : > { %v3877_v43 = vsel %vm1858_vm3, %v1827_v39, %v1637_v11  ;;  %v3947_v17 = vmul.f32 %v2892_v45, %v3625_v58  ;;  %v1432_v39 = vpop.xlane.xlu0 %1431 }
 0x46d   : > { %1560 = vrot.lane.b32.xlu1 %v3871_v8, %s2956_s26  ;;  %1578 = vrot.lane.b32.xlu0 %v3874_v61, %s2956_s26 }
 0x46f   : > { %v3883_v38 = vpop.permute.xlu1 %1732 }
 0x471   : > { %1656 = vrot.lane.b32.xlu1 %v3871_v8, %s2957_s27  ;;  %1674 = vrot.lane.b32.xlu0 %v3874_v61, %s2957_s27 }
 0x473   : > { %v1539_v32 = vpop.permute.xlu1 %1538 }
 0x474   : > { %v1826_v54 = vsel %vm1153_vm2, %v3725_v44, %v1539_v32 }
 0x475   : > { %1752 = vrot.lane.b32.xlu1 %v3871_v8, %s2958_s28  ;;  %1770 = vrot.lane.b32.xlu0 %v3874_v61, %s2958_s28 }
 0x477   : > { %v1635_v53 = vpop.permute.xlu1 %1634 }
 0x478   : > { %v1859_v3 = vsel %vm1858_vm3, %v1826_v54, %v1635_v53 }
 0x479   : > { %1558 = vrot.lane.b32.xlu1 %v3897_v60, %s2956_s26  ;;  %1584 = vrot.lane.b32.xlu0 %v3900_v40, %s2956_s26 }
 0x47b   : > { %v1731_v5 = vpop.permute.xlu1 %1730 }
 0x47c   : > { %v3908_v44 = vsel %vm1891_vm4, %v1859_v3, %v1731_v5 }
 0x47d   : > { %1654 = vrot.lane.b32.xlu1 %v3897_v60, %s2957_s27  ;;  %1680 = vrot.lane.b32.xlu0 %v3900_v40, %s2957_s27 }
 0x47f   : > { %v1545_v36 = vpop.permute.xlu1 %1544 }
 0x480   : > { %v1829_v59 = vsel %vm1153_vm2, %v3736_v13, %v1545_v36  ;;  %v2894_v13 = vpop.eup %2893 }
 0x481   : > { %1750 = vrot.lane.b32.xlu1 %v3897_v60, %s2958_s28  ;;  %1776 = vrot.lane.b32.xlu0 %v3900_v40, %s2958_s28  ;;  %v3950_v63 = vmul.f32 %v2894_v13, %v3680_v9  ;;  %v2896_v9 = vpop.eup %2895 }
 0x482   : > { %v3971_v32 = vmul.f32 %v2896_v9, %v3685_v14  ;;  %v2898_v35 = vpop.eup %2897 }
 0x483   : > { %v1641_v10 = vpop.permute.xlu1 %1640  ;;  %v3981_v3 = vmul.f32 %v2898_v35, %v3635_v31  ;;  %v2900_v5 = vpop.eup %2899 }
 0x484   : > { %v1862_v22 = vsel %vm1858_vm3, %v1829_v59, %v1641_v10  ;;  %v4001_v24 = vmul.f32 %v2900_v5, %v3689_v23 }
 0x485   : > { %1564 = vrot.lane.b32.xlu1 %v3922_v21, %s2956_s26  ;;  %1582 = vrot.lane.b32.xlu0 %v3925_v26, %s2956_s26 }
 0x487   : > { %v1737_v57 = vpop.permute.xlu1 %1736 }
 0x488   : > { %v3933_v29 = vsel %vm1891_vm4, %v1862_v22, %v1737_v57 }
 0x489   : > { %1660 = vrot.lane.b32.xlu1 %v3922_v21, %s2957_s27  ;;  %1678 = vrot.lane.b32.xlu0 %v3925_v26, %s2957_s27 }
 0x48b   : > { %v1543_v0 = vpop.permute.xlu1 %1542 }
 0x48c   : > { %v1828_v1 = vsel %vm1153_vm2, %v3751_v12, %v1543_v0  ;;  %v1441_v12 = vpop.xlane.xlu0 %1440 }
 0x48d   : > { %1756 = vrot.lane.b32.xlu1 %v3922_v21, %s2958_s28  ;;  %1774 = vrot.lane.b32.xlu0 %v3925_v26, %s2958_s28  ;;  %2901 = vrcp.f32 %v1441_v12 }
 0x48e   : > { %2903 = vrcp.f32 %v1426_v52 }
 0x48f   : > { %v1639_v30 = vpop.permute.xlu1 %1638  ;;  %2905 = vrcp.f32 %v1435_v19 }
 0x490   : > { %v1861_v33 = vsel %vm1858_vm3, %v1828_v1, %v1639_v30  ;;  %v3978_v54 = vpop.xlane.xlu0 %1437  ;;  %2907 = vrcp.f32 %v1432_v39 }
 0x491   : > { %1562 = vrot.lane.b32.xlu1 %v3947_v17, %s2956_s26  ;;  %1588 = vrot.lane.b32.xlu0 %v3950_v63, %s2956_s26  ;;  %2909 = vrcp.f32 %v3978_v54 }
 0x493   : > { %v1735_v7 = vpop.permute.xlu1 %1734 }
 0x494   : > { %v3958_v11 = vsel %vm1891_vm4, %v1861_v33, %v1735_v7 }
 0x495   : > { %1658 = vrot.lane.b32.xlu1 %v3947_v17, %s2957_s27  ;;  %1684 = vrot.lane.b32.xlu0 %v3950_v63, %s2957_s27 }
 0x497   : > { %v1549_v58 = vpop.permute.xlu1 %1548 }
 0x498   : > { %v1831_v15 = vsel %vm1153_vm2, %v3762_v41, %v1549_v58 }
 0x499   : > { %1754 = vrot.lane.b32.xlu1 %v3947_v17, %s2958_s28  ;;  %1780 = vrot.lane.b32.xlu0 %v3950_v63, %s2958_s28 }
 0x49a   : > { %v2902_v22 = vpop.eup %2901 }
 0x49b   : > { %v1645_v50 = vpop.permute.xlu1 %1644  ;;  %v4020_v57 = vmul.f32 %v2902_v22, %v3707_v20  ;;  %v2904_v45 = vpop.eup %2903 }
 0x49c   : > { %v1864_v16 = vsel %vm1858_vm3, %v1831_v15, %v1645_v50  ;;  %v4031_v19 = vmul.f32 %v2904_v45, %v3694_v46  ;;  %v2906_v46 = vpop.eup %2905 }
 0x49d   : > { %1586 = vrot.lane.b32.xlu0 %v3971_v32, %s2956_s26  ;;  %1568 = vrot.lane.b32.xlu1 %v3769_v56, %s2956_s26  ;;  %v4052_v50 = vmul.f32 %v2906_v46, %v3699_v37  ;;  %v2908_v5 = vpop.eup %2907  ;;  %v1929_v46 = vld [vmem:[%s4521_s1 + $0x28] sm:$0xff] }
 0x49f   : > { %v1741_v53 = vpop.permute.xlu1 %1740  ;;  %v3990_v14 = vpop.permute.xlu0 %1664 }
 0x4a0   : > { %v3984_v41 = vsel %vm1891_vm4, %v1864_v16, %v1741_v53  ;;  %4528 = vst [vmem:[#allocation2_spill] sm:$0xff] %v3990_v14 }
 0x4a1   : > { %1682 = vrot.lane.b32.xlu0 %v3971_v32, %s2957_s27  ;;  %1566 = vrot.lane.b32.xlu1 %v3981_v3, %s2956_s26 }
 0x4a3   : > { %v1547_v34 = vpop.permute.xlu1 %1546 }
 0x4a4   : > { %v1830_v31 = vsel %vm1153_vm2, %v3776_v49, %v1547_v34 }
 0x4a5   : > { %1778 = vrot.lane.b32.xlu0 %v3971_v32, %s2958_s28  ;;  %1662 = vrot.lane.b32.xlu1 %v3981_v3, %s2957_s27 }
 0x4a7   : > { %v3998_v6 = vpop.permute.xlu0 %1572  ;;  %v1643_v36 = vpop.permute.xlu1 %1642 }
 0x4a8   : > { %v1863_v51 = vsel %vm1858_vm3, %v1830_v31, %v1643_v36 }
 0x4a9   : > { %1592 = vrot.lane.b32.xlu0 %v4001_v24, %s2956_s26  ;;  %1758 = vrot.lane.b32.xlu1 %v3981_v3, %s2958_s28 }
 0x4ab   : > { %v4008_v59 = vpop.permute.xlu0 %1668  ;;  %v1739_v10 = vpop.permute.xlu1 %1738 }
 0x4ac   : > { %v4011_v49 = vsel %vm1891_vm4, %v1863_v51, %v1739_v10  ;;  %v4073_v51 = vmul.f32 %v2908_v5, %v3703_v55 }
 0x4ad   : > { %1688 = vrot.lane.b32.xlu0 %v4001_v24, %s2957_s27  ;;  %1666 = vrot.lane.b32.xlu1 %v3799_v28, %s2957_s27 }
 0x4af   : > { %v4017_v23 = vpop.permute.xlu0 %1764  ;;  %v1553_v52 = vpop.permute.xlu1 %1552 }
 0x4b0   : > { %v1833_v0 = vsel %vm1153_vm2, %v3792_v27, %v1553_v52 }
 0x4b1   : > { %1784 = vrot.lane.b32.xlu0 %v4001_v24, %s2958_s28  ;;  %1792 = vrot.lane.b32.xlu1 %v4020_v57, %s2958_s28 }
 0x4b3   : > { %v4028_v13 = vpop.permute.xlu0 %1570  ;;  %v1649_v1 = vpop.permute.xlu1 %1648 }
 0x4b4   : > { %v1866_v30 = vsel %vm1858_vm3, %v1833_v0, %v1649_v1 }
 0x4b5   : > { %1590 = vrot.lane.b32.xlu0 %v4031_v19, %s2956_s26 }
 0x4b7   : > { %v4036_v20 = vpop.permute.xlu0 %1762  ;;  %v1745_v33 = vpop.permute.xlu1 %1744 }
 0x4b8   : > { %v4039_v7 = vsel %vm1891_vm4, %v1866_v30, %v1745_v33 }
 0x4b9   : > { %1686 = vrot.lane.b32.xlu0 %v4031_v19, %s2957_s27 }
 0x4bb   : > { %v4043_v27 = vpop.permute.xlu0 %1576  ;;  %v1551_v58 = vpop.permute.xlu1 %1550 }
 0x4bc   : > { %v1832_v9 = vsel %vm1153_vm2, %v3810_v4, %v1551_v58 }
 0x4bd   : > { %1782 = vrot.lane.b32.xlu0 %v4031_v19, %s2958_s28 }
 0x4bf   : > { %v4049_v12 = vpop.permute.xlu0 %1672  ;;  %v1647_v15 = vpop.permute.xlu1 %1646 }
 0x4c0   : > { %v1865_v35 = vsel %vm1858_vm3, %v1832_v9, %v1647_v15 }
 0x4c1   : > { %1596 = vrot.lane.b32.xlu0 %v4052_v50, %s2956_s26 }
 0x4c3   : > { %v4057_v39 = vpop.permute.xlu0 %1768  ;;  %v1743_v16 = vpop.permute.xlu1 %1742 }
 0x4c4   : > { %v4060_v53 = vsel %vm1891_vm4, %v1865_v35, %v1743_v16 }
 0x4c5   : > { %1692 = vrot.lane.b32.xlu0 %v4052_v50, %s2957_s27 }
 0x4c7   : > { %v4064_v4 = vpop.permute.xlu0 %1574  ;;  %v1557_v34 = vpop.permute.xlu1 %1556 }
 0x4c8   : > { %v1835_v37 = vsel %vm1153_vm2, %v3829_v42, %v1557_v34  ;;  %v4107_v34 = vmul.f32 %v1929_v46, %v3984_v41 }
 0x4c9   : > { %1788 = vrot.lane.b32.xlu0 %v4052_v50, %s2958_s28 }
 0x4cb   : > { %v4070_v31 = vpop.permute.xlu0 %1670  ;;  %v1653_v36 = vpop.permute.xlu1 %1652 }
 0x4cc   : > { %v1868_v10 = vsel %vm1858_vm3, %v1835_v37, %v1653_v36 }
 0x4cd   : > { %1594 = vrot.lane.b32.xlu0 %v4073_v51, %s2956_s26 }
 0x4cf   : > { %v4079_v22 = vpop.permute.xlu0 %1766  ;;  %v1749_v52 = vpop.permute.xlu1 %1748 }
 0x4d0   : > { %v4082_v45 = vsel %vm1891_vm4, %v1868_v10, %v1749_v52 }
 0x4d1   : > { %1690 = vrot.lane.b32.xlu0 %v4073_v51, %s2957_s27 }
 0x4d3   : > { %v1581_v42 = vpop.permute.xlu0 %1580  ;;  %v1555_v0 = vpop.permute.xlu1 %1554 }
 0x4d4   : > { %v1847_v55 = vsel %vm1153_vm2, %v3851_v62, %v1581_v42  ;;  %v1834_v54 = vsel %vm1153_vm2, %v3848_v25, %v1555_v0  ;;  %v1945_v62 = vld [vmem:[%s4521_s1 + $0xa8] sm:$0xff]  ;;  %v2910_v25 = vpop.eup %2909 }
 0x4d5   : > { %1786 = vrot.lane.b32.xlu0 %v4073_v51, %s2958_s28  ;;  %v4114_v10 = vmul.f32 %v2910_v25, %v3711_v18  ;;  %v1928_v18 = vld [vmem:[%s4521_s1 + $0x20] sm:$0xff]  ;;  %v1843_v25 = vsel %vm1153_vm2, %v3781_v2, %v3998_v6  ;;  %v1941_v2 = vld [vmem:[%s4521_s1 + $0x88] sm:$0xff] }
 0x4d6   : > { %v4139_v46 = vmul.f32 %v1928_v18, %v4011_v49 }
 0x4d7   : > { %v1677_v1 = vpop.permute.xlu0 %1676  ;;  %v1651_v30 = vpop.permute.xlu1 %1650 }
 0x4d8   : > { %v1880_v33 = vsel %vm1858_vm3, %v1847_v55, %v1677_v1  ;;  %v1867_v58 = vsel %vm1858_vm3, %v1834_v54, %v1651_v30 }
 0x4d9   : > { %1600 = vrot.lane.b32.xlu0 %v4020_v57, %s2956_s26 }
 0x4db   : > { %v1773_v9 = vpop.permute.xlu0 %1772  ;;  %v1747_v15 = vpop.permute.xlu1 %1746 }
 0x4dc   : > { %v1913_v35 = vsel %vm1891_vm4, %v1880_v33, %v1773_v9  ;;  %v4104_v16 = vsel %vm1891_vm4, %v1867_v58, %v1747_v15 }
 0x4dd   : > { %v4109_v5 = vmul.f32 %v1945_v62, %v1913_v35  ;;  %1696 = vrot.lane.b32.xlu0 %v4020_v57, %s2957_s27 }
 0x4df   : > { %v1579_v37 = vpop.permute.xlu0 %1578  ;;  %v1561_v36 = vpop.permute.xlu1 %1560 }
 0x4e0   : > { %v1846_v41 = vsel %vm1153_vm2, %v3874_v61, %v1579_v37  ;;  %v1837_v42 = vsel %vm1153_vm2, %v3871_v8, %v1561_v36  ;;  %v1944_v61 = vld [vmem:[%s4521_s1 + $0xa0] sm:$0xff] }
 0x4e1   : > { %1598 = vrot.lane.b32.xlu0 %v4114_v10, %s2956_s26 }
 0x4e3   : > { %v1675_v0 = vpop.permute.xlu0 %1674  ;;  %v1657_v55 = vpop.permute.xlu1 %1656 }
 0x4e4   : > { %v1879_v54 = vsel %vm1858_vm3, %v1846_v41, %v1675_v0  ;;  %v1870_v1 = vsel %vm1858_vm3, %v1837_v42, %v1657_v55  ;;  %v1931_v0 = vld [vmem:[%s4521_s1 + $0x38] sm:$0xff] }
 0x4e5   : > { %1694 = vrot.lane.b32.xlu0 %v4114_v10, %s2957_s27  ;;  %v1947_v55 = vld [vmem:[%s4521_s1 + $0xb8] sm:$0xff]  ;;  %v4166_v18 = vmul.f32 %v1931_v0, %v4039_v7 }
 0x4e7   : > { %v1771_v30 = vpop.permute.xlu0 %1770  ;;  %v1753_v33 = vpop.permute.xlu1 %1752 }
 0x4e8   : > { %v1912_v8 = vsel %vm1891_vm4, %v1879_v54, %v1771_v30  ;;  %v4136_v58 = vsel %vm1891_vm4, %v1870_v1, %v1753_v33 }
 0x4e9   : > { %v4141_v62 = vmul.f32 %v1944_v61, %v1912_v8  ;;  %1790 = vrot.lane.b32.xlu0 %v4114_v10, %s2958_s28 }
 0x4eb   : > { %v1585_v9 = vpop.permute.xlu0 %1584  ;;  %v1559_v15 = vpop.permute.xlu1 %1558 }
 0x4ec   : > { %v1849_v35 = vsel %vm1153_vm2, %v3900_v40, %v1585_v9  ;;  %v1836_v49 = vsel %vm1153_vm2, %v3897_v60, %v1559_v15 }
 0x4ed   : > { %1760 = vrot.lane.b32.xlu0 %v3769_v56, %s2958_s28 }
 0x4ef   : > { %v1681_v37 = vpop.permute.xlu0 %1680  ;;  %v1655_v36 = vpop.permute.xlu1 %1654 }
 0x4f0   : > { %v1882_v41 = vsel %vm1858_vm3, %v1849_v35, %v1681_v37  ;;  %v1869_v42 = vsel %vm1858_vm3, %v1836_v49, %v1655_v36 }
 0x4f3   : > { %v1777_v54 = vpop.permute.xlu0 %1776  ;;  %v1751_v1 = vpop.permute.xlu1 %1750 }
 0x4f4   : > { %v1915_v40 = vsel %vm1891_vm4, %v1882_v41, %v1777_v54  ;;  %v4163_v60 = vsel %vm1891_vm4, %v1869_v42, %v1751_v1 }
 0x4f5   : > { %v4168_v61 = vmul.f32 %v1947_v55, %v1915_v40 }
 0x4f7   : > { %v4170_v30 = vpop.permute.xlu0 %1582  ;;  %v1565_v33 = vpop.permute.xlu1 %1564 }
 0x4f8   : > { %v1839_v9 = vsel %vm1153_vm2, %v3922_v21, %v1565_v33 }
 0x4fb   : > { %v4176_v15 = vpop.permute.xlu0 %1678  ;;  %v1661_v35 = vpop.permute.xlu1 %1660 }
 0x4fc   : > { %v1872_v49 = vsel %vm1858_vm3, %v1839_v9, %v1661_v35 }
 0x4ff   : > { %v4179_v37 = vpop.permute.xlu0 %1774  ;;  %v1757_v7 = vpop.permute.xlu1 %1756 }
 0x500   : > { %v4182_v36 = vsel %vm1891_vm4, %v1872_v49, %v1757_v7 }
 0x503   : > { %v4184_v41 = vpop.permute.xlu0 %1588  ;;  %v1563_v42 = vpop.permute.xlu1 %1562 }
 0x504   : > { %v1838_v0 = vsel %vm1153_vm2, %v3947_v17, %v1563_v42 }
 0x507   : > { %v4188_v55 = vpop.permute.xlu0 %1684  ;;  %v1659_v21 = vpop.permute.xlu1 %1658 }
 0x508   : > { %v1871_v54 = vsel %vm1858_vm3, %v1838_v0, %v1659_v21 }
 0x50b   : > { %v4191_v1 = vpop.permute.xlu0 %1780  ;;  %v1755_v40 = vpop.permute.xlu1 %1754 }
 0x50c   : > { %v4194_v33 = vsel %vm1891_vm4, %v1871_v54, %v1755_v40  ;;  %v1924_v40 = vld [vmem:[%s4521_s1] sm:$0xff] }
 0x50f   : > { %v4196_v9 = vpop.permute.xlu0 %1586  ;;  %v4198_v35 = vpop.permute.xlu1 %1568 }
 0x513   : > { %v4200_v49 = vpop.permute.xlu0 %1682  ;;  %v1567_v7 = vpop.permute.xlu1 %1566 }
 0x514   : > { %v1840_v17 = vsel %vm1153_vm2, %v3981_v3, %v1567_v7  ;;  %v1842_v3 = vsel %vm1153_vm2, %v3799_v28, %v4028_v13  ;;  %v1956_v13 = vmul.f32 %v1924_v40, %v3908_v44  ;;  %v1942_v40 = vld [vmem:[%s4521_s1 + $0x90] sm:$0xff] }
 0x517   : > { %v4204_v42 = vpop.permute.xlu0 %1778  ;;  %v1663_v8 = vpop.permute.xlu1 %1662 }
 0x518   : > { %v1873_v0 = vsel %vm1858_vm3, %v1840_v17, %v1663_v8  ;;  %v1940_v8 = vld [vmem:[%s4521_s1 + $0x80] sm:$0xff]  ;;  %v1876_v17 = vsel %vm1858_vm3, %v1843_v25, %v4008_v59  ;;  %v1893_v59 = vsel %vm1891_vm4, %v3877_v43, %v3883_v38  ;;  %v1844_v25 = vsel %vm1153_vm2, %v3832_v48, %v4064_v4  ;;  %v1926_v48 = vld [vmem:[%s4521_s1 + $0x10] sm:$0xff] }
 0x519   : > { %v1909_v6 = vsel %vm1891_vm4, %v1876_v17, %v4017_v23  ;;  %v1845_v43 = vsel %vm1153_vm2, %v3813_v47, %v4043_v27  ;;  %v1958_v17 = vmul.f32 %v1926_v48, %v3958_v11  ;;  %v1927_v47 = vld [vmem:[%s4521_s1 + $0x18] sm:$0xff]  ;;  %v4532_v48 = vpack.i.bf16 %v4166_v18, %v4168_v61  ;;  %v1934_v61 = vld [vmem:[%s4521_s1 + $0x50] sm:$0xff] }
 0x51a   : > { %v1973_v23 = vmul.f32 %v1941_v2, %v1909_v6 }
 0x51b   : > { %v4207_v21 = vpop.permute.xlu0 %1592  ;;  %v1759_v52 = vpop.permute.xlu1 %1758 }
 0x51c   : > { %v4210_v54 = vsel %vm1891_vm4, %v1873_v0, %v1759_v52 }
 0x51d   : > { %4529 = vst [vmem:[#allocation3_spill] sm:$0xff] %v4210_v54  ;;  %v1925_v54 = vld [vmem:[%s4521_s1 + $0x8] sm:$0xff] }
 0x51f   : > { %v4221_v7 = vpop.permute.xlu0 %1688  ;;  %v1667_v52 = vpop.permute.xlu1 %1666 }
 0x520   : > { %v1875_v0 = vsel %vm1858_vm3, %v1842_v3, %v1667_v52  ;;  %v1957_v52 = vmul.f32 %v1925_v54, %v1893_v59  ;;  %v1946_v59 = vld [vmem:[%s4521_s1 + $0xb0] sm:$0xff] }
 0x521   : > { %v1908_v28 = vsel %vm1891_vm4, %v1875_v0, %v4036_v20  ;;  %v1877_v20 = vsel %vm1858_vm3, %v1844_v25, %v4070_v31 }
 0x522   : > { %v1972_v14 = vmul.f32 %v1940_v8, %v1908_v28  ;;  %v1910_v8 = vsel %vm1891_vm4, %v1877_v20, %v4079_v22  ;;  %v2667_v31 = vpack.i.bf16 %v1957_v52, %v1973_v23  ;;  %v1943_v22 = vld [vmem:[%s4521_s1 + $0x98] sm:$0xff]  ;;  %v1930_v23 = vld [vmem:[%s4521_s1 + $0x30] sm:$0xff] }
 0x523   : > { %v4246_v3 = vpop.permute.xlu0 %1784  ;;  %v1974_v4 = vmul.f32 %v1942_v40, %v1910_v8  ;;  %v1962_v20 = vmul.f32 %v1930_v23, %v4060_v53  ;;  %v1948_v40 = vld [vmem:[%s4521_s1 + $0xc0] sm:$0xff]  ;;  %v1949_v8 = vld [vmem:[%s4521_s1 + $0xc8] sm:$0xff] }
 0x524   : > { %v2665_v44 = vpack.i.bf16 %v1956_v13, %v1972_v14  ;;  %v1878_v14 = vsel %vm1858_vm3, %v1845_v43, %v4049_v12  ;;  %v1959_v12 = vmul.f32 %v1927_v47, %v3933_v29  ;;  %v4530_v29 = vpack.i.bf16 %v4139_v46, %v4141_v62  ;;  %v1937_v23 = vld [vmem:[%s4521_s1 + $0x68] sm:$0xff] }
 0x525   : > { %v1911_v54 = vsel %vm1891_vm4, %v1878_v14, %v4057_v39  ;;  %v2669_v2 = vpack.i.bf16 %v1958_v17, %v1974_v4  ;;  %v1848_v39 = vsel %vm1153_vm2, %v3925_v26, %v4170_v30  ;;  %v1951_v17 = vld [vmem:[%s4521_s1 + $0xd8] sm:$0xff]  ;;  %v1966_v47 = vmul.f32 %v1934_v61, %v4163_v60 }
 0x526   : > { %2666 = vxpose.xlu1.b32.start [1/16] (narrow) %v2665_v44, 32  ;;  %v1975_v0 = vmul.f32 %v1943_v22, %v1911_v54  ;;  %v1881_v11 = vsel %vm1858_vm3, %v1848_v39, %v4176_v15  ;;  %v4531_v15 = vpack.i.bf16 %v4107_v34, %v4109_v5  ;;  %v1932_v34 = vld [vmem:[%s4521_s1 + $0x40] sm:$0xff] }
 0x527   : > { %v1591_v38 = vpop.permute.xlu0 %1590  ;;  %v1914_v25 = vsel %vm1891_vm4, %v1881_v11, %v4179_v37  ;;  %v1850_v37 = vsel %vm1153_vm2, %v3971_v32, %v4196_v9  ;;  %v1851_v32 = vsel %vm1153_vm2, %v3950_v63, %v4184_v41  ;;  %v1964_v52 = vmul.f32 %v1932_v34, %v4104_v16  ;;  %v1933_v63 = vld [vmem:[%s4521_s1 + $0x48] sm:$0xff]  ;;  %v1950_v16 = vld [vmem:[%s4521_s1 + $0xd0] sm:$0xff] }
 0x528   : > { %v2671_v28 = vpack.i.bf16 %v1959_v12, %v1975_v0  ;;  %v1978_v30 = vmul.f32 %v1946_v59, %v1914_v25  ;;  %v1883_v46 = vsel %vm1858_vm3, %v1850_v37, %v4200_v49  ;;  %v1884_v9 = vsel %vm1858_vm3, %v1851_v32, %v4188_v55  ;;  %v1952_v12 = vld [vmem:[%s4521_s1 + $0xe0] sm:$0xff]  ;;  %v1953_v25 = vld [vmem:[%s4521_s1 + $0xe8] sm:$0xff]  ;;  %v1938_v37 = vld [vmem:[%s4521_s1 + $0x70] sm:$0xff] }
 0x529   : > { %v1916_v53 = vsel %vm1891_vm4, %v1883_v46, %v4204_v42  ;;  %v1917_v42 = vsel %vm1891_vm4, %v1884_v9, %v4191_v1  ;;  %v1852_v41 = vsel %vm1153_vm2, %v4031_v19, %v1591_v38  ;;  %v1965_v18 = vmul.f32 %v1933_v63, %v4082_v45  ;;  %v1954_v46 = vld [vmem:[%s4521_s1 + $0xf0] sm:$0xff]  ;;  %v1955_v9 = vld [vmem:[%s4521_s1 + $0xf8] sm:$0xff] }
 0x52a   : > { %2668 = vxpose.xlu1.b32.cont [2/16] (narrow) %v2667_v31, 32  ;;  %v2677_v62 = vpack.i.bf16 %v1962_v20, %v1978_v30  ;;  %v1980_v49 = vmul.f32 %v1948_v40, %v1916_v53  ;;  %v1981_v43 = vmul.f32 %v1949_v8, %v1917_v42  ;;  %v1853_v19 = vsel %vm1153_vm2, %v4001_v24, %v4207_v21  ;;  %v1935_v24 = vld [vmem:[%s4521_s1 + $0x58] sm:$0xff] }
 0x52b   : > { %v1687_v27 = vpop.permute.xlu0 %1686  ;;  %v1886_v31 = vsel %vm1858_vm3, %v1853_v19, %v4221_v7  ;;  %v1967_v60 = vmul.f32 %v1935_v24, %v4136_v58  ;;  %v1841_v53 = vsel %vm1153_vm2, %v3769_v56, %v4198_v35  ;;  %v1939_v8 = vld [vmem:[%s4521_s1 + $0x78] sm:$0xff] }
 0x52c   : > { %v1885_v14 = vsel %vm1858_vm3, %v1852_v41, %v1687_v27  ;;  %v2681_v4 = vpack.i.bf16 %v1964_v52, %v1980_v49  ;;  %v2683_v54 = vpack.i.bf16 %v1965_v18, %v1981_v43  ;;  %v1919_v45 = vsel %vm1891_vm4, %v1886_v31, %v4246_v3  ;;  %v4534_v52 = vld [vmem:[#allocation2_spill] sm:$0xff] }
 0x52d   : > { %v1983_v27 = vmul.f32 %v1951_v17, %v1919_v45  ;;  %v1874_v56 = vsel %vm1858_vm3, %v1841_v53, %v4534_v52  ;;  %v2959_v17 = vmov 0  }
 0x52e   : > { %2670 = vxpose.xlu1.b32.cont [3/16] (narrow) %v2669_v2, 32  ;;  %2717 = vset.pattern.permute.xlu0 %v2959_v17 }
 0x52f   : > { %v1783_v6 = vpop.permute.xlu0 %1782  ;;  %v2687_v59 = vpack.i.bf16 %v1967_v60, %v1983_v27 }
 0x530   : > { %v1918_v1 = vsel %vm1891_vm4, %v1885_v14, %v1783_v6  ;;  %v1936_v6 = vld [vmem:[%s4521_s1 + $0x60] sm:$0xff] }
 0x531   : > { %v1982_v22 = vmul.f32 %v1950_v16, %v1918_v1  ;;  %v1968_v58 = vmul.f32 %v1936_v6, %v4194_v33 }
 0x532   : > { %2672 = vxpose.xlu1.b32.cont [4/16] (narrow) %v2671_v28, 32 }
 0x533   : > { %v1597_v13 = vpop.permute.xlu0 %1596  ;;  %v2685_v2 = vpack.i.bf16 %v1966_v47, %v1982_v22 }
 0x536   : > { %2674 = vxpose.xlu1.b32.cont [5/16] (narrow) %v4530_v29, 32 }
 0x537   : > { %v1693_v26 = vpop.permute.xlu0 %1692 }
 0x53a   : > { %2676 = vxpose.xlu1.b32.cont [6/16] (narrow) %v4531_v15, 32 }
 0x53b   : > { %v1789_v44 = vpop.permute.xlu0 %1788 }
 0x53e   : > { %2678 = vxpose.xlu1.b32.cont [7/16] (narrow) %v2677_v62, 32 }
 0x53f   : > { %v1595_v5 = vpop.permute.xlu0 %1594 }
 0x540   : > { %v1854_v21 = vsel %vm1153_vm2, %v4073_v51, %v1595_v5  ;;  %v1855_v51 = vsel %vm1153_vm2, %v4052_v50, %v1597_v13  ;;  %v1793_v5 = vpop.permute.xlu1 %1792 }
 0x541   : > { %v1888_v39 = vsel %vm1858_vm3, %v1855_v51, %v1693_v26  ;;  %v1969_v26 = vmul.f32 %v1937_v23, %v4182_v36 }
 0x542   : > { %2680 = vxpose.xlu1.b32.cont [8/16] (narrow) %v4532_v48, 32  ;;  %v1921_v29 = vsel %vm1891_vm4, %v1888_v39, %v1789_v44 }
 0x543   : > { %v1691_v55 = vpop.permute.xlu0 %1690  ;;  %v1985_v50 = vmul.f32 %v1953_v25, %v1921_v29 }
 0x544   : > { %v1887_v0 = vsel %vm1858_vm3, %v1854_v21, %v1691_v55 }
 0x545   : > { %v2691_v15 = vpack.i.bf16 %v1969_v26, %v1985_v50 }
 0x546   : > { %2682 = vxpose.xlu1.b32.cont [9/16] (narrow) %v2681_v4, 32 }
 0x547   : > { %v1787_v38 = vpop.permute.xlu0 %1786 }
 0x548   : > { %v1920_v3 = vsel %vm1891_vm4, %v1887_v0, %v1787_v38 }
 0x549   : > { %v1984_v11 = vmul.f32 %v1952_v12, %v1920_v3  ;;  %v2141_v12 = vld [vmem:[%s4526_s6] sm:$0xff] }
 0x54a   : > { %2684 = vxpose.xlu1.b32.cont [10/16] (narrow) %v2683_v54, 32 }
 0x54b   : > { %v1601_v7 = vpop.permute.xlu0 %1600  ;;  %v2689_v13 = vpack.i.bf16 %v1968_v58, %v1984_v11 }
 0x54c   : > { %v1857_v33 = vsel %vm1153_vm2, %v4020_v57, %v1601_v7  ;;  %v4533_v57 = vld [vmem:[#allocation3_spill] sm:$0xff] }
 0x54d   : > { %v1970_v32 = vmul.f32 %v1938_v37, %v4533_v57 }
 0x54e   : > { %2686 = vxpose.xlu1.b32.cont [11/16] (narrow) %v2685_v2, 32 }
 0x54f   : > { %v1697_v28 = vpop.permute.xlu0 %1696 }
 0x550   : > { %v1890_v36 = vsel %vm1858_vm3, %v1857_v33, %v1697_v28 }
 0x551   : > { %v1923_v49 = vsel %vm1891_vm4, %v1890_v36, %v1793_v5 }
 0x552   : > { %2688 = vxpose.xlu1.b32.cont [12/16] (narrow) %v2687_v59, 32  ;;  %v1987_v63 = vmul.f32 %v1955_v9, %v1923_v49 }
 0x553   : > { %v1599_v30 = vpop.permute.xlu0 %1598 }
 0x554   : > { %v1856_v44 = vsel %vm1153_vm2, %v4114_v10, %v1599_v30 }
 0x556   : > { %2690 = vxpose.xlu1.b32.cont [13/16] (narrow) %v2689_v13, 32 }
 0x557   : > { %v1695_v20 = vpop.permute.xlu0 %1694 }
 0x558   : > { %v1889_v62 = vsel %vm1858_vm3, %v1856_v44, %v1695_v20 }
 0x55a   : > { %2692 = vxpose.xlu1.b32.cont [14/16] (narrow) %v2691_v15, 32 }
 0x55b   : > { %v1791_v40 = vpop.permute.xlu0 %1790 }
 0x55c   : > { %v1922_v34 = vsel %vm1891_vm4, %v1889_v62, %v1791_v40 }
 0x55d   : > { %v1986_v10 = vmul.f32 %v1954_v46, %v1922_v34 }
 0x55f   : > { %v1761_v42 = vpop.permute.xlu0 %1760  ;;  %v2693_v35 = vpack.i.bf16 %v1970_v32, %v1986_v10 }
 0x560   : > { %v1907_v48 = vsel %vm1891_vm4, %v1874_v56, %v1761_v42 }
 0x561   : > { %v1971_v41 = vmul.f32 %v1939_v8, %v1907_v48  ;;  %2694 = vxpose.xlu1.b32.cont [15/16] (narrow) %v2693_v35, 32 }
 0x563   : > { %v2695_v55 = vpack.i.bf16 %v1971_v41, %v1987_v63 }
 0x565   : > { %2696 = vxpose.xlu1.b32.end [16/16] (narrow) %v2695_v55, 32 }
 0x5a5   : > { %v2697_v43 = vpop.trf.xlu1 }
 0x5a6   : > { %v2701_v14 = vunpack.i.h.bf16 %v2697_v43  ;;  %v2698_v4 = vunpack.i.l.bf16 %v2697_v43 }
 0x5a8   : > { %2116 = vmatprep.mubr.f32.mxu0 %v2698_v4 }
 0x5a9   : > { %v2702_v16 = vpop.trf.xlu1  ;;  %2117 = vmatmul.mubr.f32.vlgmr.msra.gmra.mxu0 %v2701_v14 }
 0x5aa   : > { %v2703_v1 = vunpack.i.l.bf16 %v2702_v16  ;;  %v2706_v18 = vunpack.i.h.bf16 %v2702_v16 }
 0x5ac   : > { %2122 = vmatprep.mubr.f32.mxu0 %v2703_v1 }
 0x5ad   : > { %v2707_v61 = vpop.trf.xlu1  ;;  %2123 = vmatmul.mubr.f32.gmra.mxu0 %v2706_v18 }
 0x5ae   : > { %v2708_v19 = vunpack.i.l.bf16 %v2707_v61  ;;  %v2711_v38 = vunpack.i.h.bf16 %v2707_v61 }
 0x5b0   : > { %2128 = vmatprep.mubr.f32.mxu0 %v2708_v19 }
 0x5b1   : > { %v2712_v31 = vpop.trf.xlu1  ;;  %2129 = vmatmul.mubr.f32.gmra.mxu0 %v2711_v38 }
 0x5b2   : > { %v2716_v22 = vunpack.i.h.bf16 %v2712_v31  ;;  %v2713_v54 = vunpack.i.l.bf16 %v2712_v31 }
 0x5b4   : > { %2134 = vmatprep.mubr.f32.mxu0 %v2713_v54 }
 0x5b5   : > { %2135 = vmatmul.mubr.f32.gmra.mxu0 %v2716_v22 }
 0x669   : > { %v2118_v45 = vpop.f32.mrf.mxu0 }
 0x66b   : > { %v2120_v47 = vpop.f32.mrf.mxu0 }
 0x66c   : > { %2144 = vperm.xlu0 %2717, %v2120_v47  }
 0x66d   : > { %v2124_v24 = vpop.f32.mrf.mxu0 }
 0x66f   : > { %v2126_v21 = vpop.f32.mrf.mxu0 }
 0x670   : > { %2149 = vperm.xlu0 %2717, %v2126_v21  }
 0x671   : > { %v2130_v7 = vpop.f32.mrf.mxu0 }
 0x673   : > { %v2132_v27 = vpop.f32.mrf.mxu0 }
 0x674   : > { %2154 = vperm.xlu0 %2717, %v2132_v27  }
 0x675   : > { %v2136_v0 = vpop.f32.mrf.mxu0 }
 0x677   : > { %v2138_v2 = vpop.f32.mrf.mxu0 }
 0x678   : > { %2159 = vperm.xlu0 %2717, %v2138_v2  }
 0x6e7   : > { %v2145_v3 = vpop.permute.xlu0 %2144 }
 0x6e8   : > { %v2162_v60 = vmul.f32 %v2145_v3, %v2141_v12 }
 0x6ea   : > { %v4401_v6 = vsub.f32 %v2118_v45, %v2162_v60 }
 0x6eb   : > { %v2150_v51 = vpop.permute.xlu0 %2149 }
 0x6ec   : > { %v2163_v28 = vmul.f32 %v2150_v51, %v2141_v12  ;;  %v2181_v39 = vmul.f32 %v4401_v6, %v4401_v6 }
 0x6ee   : > { %v4405_v11 = vsub.f32 %v2124_v24, %v2163_v28  ;;  %2195 = vadd.xlane.f32.xlu0 %v2181_v39 }
 0x6ef   : > { %v2155_v59 = vpop.permute.xlu0 %2154 }
 0x6f0   : > { %v2164_v25 = vmul.f32 %v2155_v59, %v2141_v12  ;;  %v2182_v29 = vmul.f32 %v4405_v11, %v4405_v11  ;;  %v4411_v58 = vadd.f32 %v4405_v11, %v4401_v6 }
 0x6f2   : > { %2197 = vadd.xlane.f32.xlu0 %v2182_v29  ;;  %v4413_v30 = vsub.f32 %v2130_v7, %v2164_v25  ;;  %v2177_v13 = vmul.f32 %v4411_v58, %v4411_v58 }
 0x6f3   : > { %v2160_v23 = vpop.permute.xlu0 %2159 }
 0x6f4   : > { %v2165_v50 = vmul.f32 %v2160_v23, %v2141_v12  ;;  %v2183_v20 = vmul.f32 %v4413_v30, %v4413_v30  ;;  %v4423_v15 = vadd.f32 %v4413_v30, %v4401_v6  ;;  %v2171_v37 = vadd.f32 %v4411_v58, %v4413_v30 }
 0x6f6   : > { %2187 = vadd.xlane.f32.xlu0 %v2177_v13  ;;  %v4417_v26 = vsub.f32 %v2136_v0, %v2165_v50  ;;  %v2179_v33 = vmul.f32 %v4423_v15, %v4423_v15 }
 0x6f8   : > { %v4430_v44 = vadd.f32 %v2171_v37, %v4417_v26  ;;  %v4436_v36 = vadd.f32 %v4417_v26, %v4413_v30  ;;  %v4442_v40 = vadd.f32 %v4417_v26, %v4405_v11  ;;  %v2184_v34 = vmul.f32 %v4417_v26, %v4417_v26 }
 0x6fa   : > { %2199 = vadd.xlane.f32.xlu0 %v2183_v20  ;;  %v2176_v46 = vmul.f32 %v4430_v44, %v4430_v44  ;;  %v2178_v62 = vmul.f32 %v4436_v36, %v4436_v36  ;;  %v2180_v53 = vmul.f32 %v4442_v40, %v4442_v40 }
 0x6fe   : > { %2191 = vadd.xlane.f32.xlu0 %v2179_v33 }
 0x702   : > { %2185 = vadd.xlane.f32.xlu0 %v2176_v46 }
 0x706   : > { %2189 = vadd.xlane.f32.xlu0 %v2178_v62 }
 0x70a   : > { %2193 = vadd.xlane.f32.xlu0 %v2180_v53 }
 0x70e   : > { %2201 = vadd.xlane.f32.xlu0 %v2184_v34 }
 0x777   : > { %v2196_v57 = vpop.xlane.xlu0 %2195 }
 0x778   : > { %v2208_v32 = vmax.f32 %v2196_v57, 1e-24 }
 0x77a   : > { %2911 = vrsqrt.f32 %v2208_v32 }
 0x77b   : > { %v2198_v5 = vpop.xlane.xlu0 %2197 }
 0x77c   : > { %v2209_v10 = vmax.f32 %v2198_v5, 1e-24 }
 0x77e   : > { %2913 = vrsqrt.f32 %v2209_v10 }
 0x77f   : > { %v2188_v9 = vpop.xlane.xlu0 %2187 }
 0x780   : > { %v2204_v49 = vmax.f32 %v2188_v9, 1e-24 }
 0x782   : > { %2915 = vrsqrt.f32 %v2204_v49 }
 0x783   : > { %v2200_v8 = vpop.xlane.xlu0 %2199 }
 0x784   : > { %v2210_v42 = vmax.f32 %v2200_v8, 1e-24 }
 0x786   : > { %2917 = vrsqrt.f32 %v2210_v42 }
 0x787   : > { %v4448_v52 = vpop.eup %2911  ;;  %v2192_v56 = vpop.xlane.xlu0 %2191 }
 0x788   : > { %v2226_v35 = vmul.f32 %v4448_v52, %v2196_v57  ;;  %v2206_v48 = vmax.f32 %v2192_v56, 1e-24 }
 0x78a   : > { %v2235_v63 = vmul.f32 %v4448_v52, %v2226_v35  ;;  %2919 = vrsqrt.f32 %v2206_v48 }
 0x78b   : > { %v4452_v41 = vpop.eup %2913  ;;  %v2186_v55 = vpop.xlane.xlu0 %2185 }
 0x78c   : > { %v2269_v43 = vrot.slane %v2235_v63, 4  ;;  %v2227_v14 = vmul.f32 %v4452_v41, %v2198_v5  ;;  %v2203_v4 = vmax.f32 %v2186_v55, 1e-24 }
 0x78e   : > { %v2270_v16 = vadd.f32 %v2269_v43, %v2235_v63  ;;  %v2236_v1 = vmul.f32 %v4452_v41, %v2227_v14  ;;  %2921 = vrsqrt.f32 %v2203_v4 }
 0x78f   : > { %v4456_v18 = vpop.eup %2915  ;;  %v2190_v61 = vpop.xlane.xlu0 %2189 }
 0x790   : > { %v2271_v19 = vrot.slane %v2270_v16, 2  ;;  %v2275_v38 = vrot.slane %v2236_v1, 4  ;;  %v2222_v31 = vmul.f32 %v4456_v18, %v2188_v9  ;;  %v2205_v22 = vmax.f32 %v2190_v61, 1e-24 }
 0x792   : > { %v2272_v54 = vadd.f32 %v2271_v19, %v2270_v16  ;;  %v2276_v17 = vadd.f32 %v2275_v38, %v2236_v1  ;;  %v2231_v45 = vmul.f32 %v4456_v18, %v2222_v31  ;;  %2923 = vrsqrt.f32 %v2205_v22 }
 0x793   : > { %v4460_v47 = vpop.eup %2917  ;;  %v2194_v24 = vpop.xlane.xlu0 %2193 }
 0x794   : > { %v2273_v21 = vrot.slane %v2272_v54, 1  ;;  %v2277_v7 = vrot.slane %v2276_v17, 2  ;;  %v2245_v27 = vrot.slane %v2231_v45, 4  ;;  %v2228_v0 = vmul.f32 %v4460_v47, %v2200_v8 }
 0x795   : > { %v2207_v2 = vmax.f32 %v2194_v24, 1e-24 }
 0x796   : > { %v2274_v12 = vadd.f32 %v2273_v21, %v2272_v54  ;;  %v2278_v3 = vadd.f32 %v2277_v7, %v2276_v17  ;;  %v2246_v60 = vadd.f32 %v2245_v27, %v2231_v45  ;;  %v2237_v51 = vmul.f32 %v4460_v47, %v2228_v0 }
 0x797   : > { %v4464_v28 = vpop.eup %2919  ;;  %2925 = vrsqrt.f32 %v2207_v2  ;;  %v2202_v39 = vpop.xlane.xlu0 %2201 }
 0x798   : > { %v2298_v59 = vmax.f32 %v2274_v12, 1e-24  ;;  %v2279_v25 = vrot.slane %v2278_v3, 1  ;;  %v2247_v29 = vrot.slane %v2246_v60, 2  ;;  %v2281_v23 = vrot.slane %v2237_v51, 4 }
 0x799   : > { %v2224_v50 = vmul.f32 %v4464_v28, %v2192_v56  ;;  %v2211_v13 = vmax.f32 %v2202_v39, 1e-24 }
 0x79a   : > { %2927 = vrsqrt.f32 %v2298_v59  ;;  %v2280_v20 = vadd.f32 %v2279_v25, %v2278_v3  ;;  %v2248_v37 = vadd.f32 %v2247_v29, %v2246_v60  ;;  %v2282_v33 = vadd.f32 %v2281_v23, %v2237_v51 }
 0x79b   : > { %v4467_v46 = vpop.eup %2921  ;;  %v2233_v62 = vmul.f32 %v4464_v28, %v2224_v50  ;;  %2929 = vrsqrt.f32 %v2211_v13 }
 0x79c   : > { %v2299_v53 = vmax.f32 %v2280_v20, 1e-24  ;;  %v2249_v34 = vrot.slane %v2248_v37, 1  ;;  %v2283_v57 = vrot.slane %v2282_v33, 2  ;;  %v2221_v32 = vmul.f32 %v4467_v46, %v2186_v55 }
 0x79d   : > { %v2257_v5 = vrot.slane %v2233_v62, 4 }
 0x79e   : > { %2931 = vrsqrt.f32 %v2299_v53  ;;  %v2250_v10 = vadd.f32 %v2249_v34, %v2248_v37  ;;  %v2284_v9 = vadd.f32 %v2283_v57, %v2282_v33  ;;  %v2230_v49 = vmul.f32 %v4467_v46, %v2221_v32 }
 0x79f   : > { %v4472_v8 = vpop.eup %2923  ;;  %v2258_v42 = vadd.f32 %v2257_v5, %v2233_v62 }
 0x7a0   : > { %v2294_v56 = vmax.f32 %v2250_v10, 1e-24  ;;  %v2285_v35 = vrot.slane %v2284_v9, 1  ;;  %v2239_v48 = vrot.slane %v2230_v49, 4  ;;  %v2223_v63 = vmul.f32 %v4472_v8, %v2190_v61 }
 0x7a1   : > { %v2259_v43 = vrot.slane %v2258_v42, 2 }
 0x7a2   : > { %2933 = vrsqrt.f32 %v2294_v56  ;;  %v2286_v14 = vadd.f32 %v2285_v35, %v2284_v9  ;;  %v2240_v4 = vadd.f32 %v2239_v48, %v2230_v49  ;;  %v2232_v55 = vmul.f32 %v4472_v8, %v2223_v63 }
 0x7a3   : > { %v2260_v16 = vadd.f32 %v2259_v43, %v2258_v42 }
 0x7a4   : > { %v4476_v1 = vpop.eup %2925  ;;  %v2300_v19 = vmax.f32 %v2286_v14, 1e-24  ;;  %v2241_v38 = vrot.slane %v2240_v4, 2  ;;  %v2251_v31 = vrot.slane %v2232_v55, 4 }
 0x7a5   : > { %v2261_v22 = vrot.slane %v2260_v16, 1  ;;  %v2225_v54 = vmul.f32 %v4476_v1, %v2194_v24 }
 0x7a6   : > { %2935 = vrsqrt.f32 %v2300_v19  ;;  %v2242_v17 = vadd.f32 %v2241_v38, %v2240_v4  ;;  %v2252_v45 = vadd.f32 %v2251_v31, %v2232_v55 }
 0x7a7   : > { %v2928_v61 = vpop.eup %2927  ;;  %v2262_v21 = vadd.f32 %v2261_v22, %v2260_v16  ;;  %v2234_v7 = vmul.f32 %v4476_v1, %v2225_v54 }
 0x7a8   : > { %v4481_v27 = vpop.eup %2929  ;;  %v2316_v0 = vmul.f32 %v2928_v61, %v4448_v52  ;;  %v2243_v2 = vrot.slane %v2242_v17, 1  ;;  %v2253_v12 = vrot.slane %v2252_v45, 2 }
 0x7a9   : > { %v2296_v24 = vmax.f32 %v2262_v21, 1e-24  ;;  %v2263_v3 = vrot.slane %v2234_v7, 4  ;;  %v2229_v60 = vmul.f32 %v4481_v27, %v2202_v39 }
 0x7aa   : > { %v2325_v51 = vmul.f32 %v2316_v0, %v4401_v6  ;;  %v2244_v59 = vadd.f32 %v2243_v2, %v2242_v17  ;;  %v2254_v25 = vadd.f32 %v2253_v12, %v2252_v45 }
 0x7ab   : > { %v2932_v29 = vpop.eup %2931  ;;  %2937 = vrsqrt.f32 %v2296_v24  ;;  %v2264_v52 = vadd.f32 %v2263_v3, %v2234_v7  ;;  %v2238_v23 = vmul.f32 %v4481_v27, %v2229_v60 }
 0x7ac   : > { %2334 = vst [vmem:[%s4487_s25 + $0x28] sm:$0xff] %v2325_v51  ;;  %v2317_v50 = vmul.f32 %v2932_v29, %v4452_v41  ;;  %v2293_v13 = vmax.f32 %v2244_v59, 1e-24  ;;  %v2255_v20 = vrot.slane %v2254_v25, 1 }
 0x7ad   : > { %v2265_v37 = vrot.slane %v2264_v52, 2  ;;  %v2287_v33 = vrot.slane %v2238_v23, 4 }
 0x7ae   : > { %v2326_v62 = vmul.f32 %v2317_v50, %v4405_v11  ;;  %2939 = vrsqrt.f32 %v2293_v13  ;;  %v2256_v6 = vadd.f32 %v2255_v20, %v2254_v25 }
 0x7af   : > { %v2934_v39 = vpop.eup %2933  ;;  %v2266_v53 = vadd.f32 %v2265_v37, %v2264_v52  ;;  %v2288_v34 = vadd.f32 %v2287_v33, %v2238_v23 }
 0x7b0   : > { %2335 = vst [vmem:[%s4487_s25 + $0x30] sm:$0xff] %v2326_v62  ;;  %v2312_v57 = vmul.f32 %v2934_v39, %v4456_v18  ;;  %v2295_v32 = vmax.f32 %v2256_v6, 1e-24 }
 0x7b1   : > { %v2267_v5 = vrot.slane %v2266_v53, 1  ;;  %v2289_v10 = vrot.slane %v2288_v34, 2 }
 0x7b2   : > { %v2321_v41 = vmul.f32 %v2312_v57, %v4411_v58  ;;  %2941 = vrsqrt.f32 %v2295_v32 }
 0x7b3   : > { %v2936_v9 = vpop.eup %2935  ;;  %v2268_v49 = vadd.f32 %v2267_v5, %v2266_v53  ;;  %v2290_v42 = vadd.f32 %v2289_v10, %v2288_v34 }
 0x7b4   : > { %2330 = vst [vmem:[%s4487_s25 + $0x8] sm:$0xff] %v2321_v41  ;;  %v2318_v11 = vmul.f32 %v2936_v9, %v4460_v47 }
 0x7b5   : > { %v2297_v56 = vmax.f32 %v2268_v49, 1e-24  ;;  %v2291_v35 = vrot.slane %v2290_v42, 1 }
 0x7b6   : > { %v2327_v48 = vmul.f32 %v2318_v11, %v4413_v30 }
 0x7b7   : > { %2943 = vrsqrt.f32 %v2297_v56  ;;  %v2292_v18 = vadd.f32 %v2291_v35, %v2290_v42 }
 0x7b8   : > { %v2938_v63 = vpop.eup %2937  ;;  %2336 = vst [vmem:[%s4487_s25 + $0x38] sm:$0xff] %v2327_v48 }
 0x7b9   : > { %v2314_v58 = vmul.f32 %v2938_v63, %v4464_v28  ;;  %v2301_v43 = vmax.f32 %v2292_v18, 1e-24 }
 0x7bb   : > { %v2940_v14 = vpop.eup %2939  ;;  %v2323_v4 = vmul.f32 %v2314_v58, %v4423_v15  ;;  %2945 = vrsqrt.f32 %v2301_v43 }
 0x7bc   : > { %v2311_v47 = vmul.f32 %v2940_v14, %v4467_v46 }
 0x7bd   : > { %2332 = vst [vmem:[%s4487_s25 + $0x18] sm:$0xff] %v2323_v4 }
 0x7be   : > { %v2320_v55 = vmul.f32 %v2311_v47, %v4430_v44 }
 0x7bf   : > { %v2942_v30 = vpop.eup %2941 }
 0x7c0   : > { %2329 = vst [vmem:[%s4487_s25] sm:$0xff] %v2320_v55  ;;  %v2313_v16 = vmul.f32 %v2942_v30, %v4472_v8 }
 0x7c2   : > { %v2322_v19 = vmul.f32 %v2313_v16, %v4436_v36 }
 0x7c4   : > { %v2944_v38 = vpop.eup %2943  ;;  %2331 = vst [vmem:[%s4487_s25 + $0x10] sm:$0xff] %v2322_v19 }
 0x7c5   : > { %v2315_v28 = vmul.f32 %v2944_v38, %v4476_v1 }
 0x7c7   : > { %v2324_v31 = vmul.f32 %v2315_v28, %v4442_v40 }
 0x7c8   : > { %v2946_v15 = vpop.eup %2945 }
 0x7c9   : > { %2333 = vst [vmem:[%s4487_s25 + $0x20] sm:$0xff] %v2324_v31  ;;  %v2319_v22 = vmul.f32 %v2946_v15, %v4481_v27 }
 0x7cb   : > { %v2328_v46 = vmul.f32 %v2319_v22, %v4417_v26 }
 0x7cd   : > { %2337 = vst [vmem:[%s4487_s25 + $0x40] sm:$0xff] %v2328_v46 }
 0x7ce PF: > { %s17_s24 = sadd.s32 1, %s2953_s24  }
 0x7cf   : > { %p14_p4 = scmp.ge.s32.totalorder %s17_s24, 6  }
 0x7d1   :  { %16 = sbr.rel (!%p14_p4) target bundleno = 1 (0x1), region = 78 }

</bundles_post_ra>
